<compile_context>
chip_gen: v6e
topology: v6e:2x2x1
jax: 0.10.0
libtpu: 0.0.40
codegen_flags: <defaults>
</compile_context>

<pallas_src>
import functools

import jax
import jax.numpy as jnp
from jax import lax
from jax.experimental import pallas as pl
from jax.experimental.pallas import tpu as pltpu

# --- D3 constants (from the PyTorch module) ---
D3_A1 = 0.3385
D3_A2 = 2.883
D3_K1 = 16.0
D3_K3 = -4.0
D3_S6 = 1.0
D3_S8 = 0.9171
D3_MAXC = 5
D3_MAXC2 = D3_MAXC * D3_MAXC      # 25 CN reference points (no row padding)
EPS = 1e-10

LANES = 128
VMEM_LIMIT = 32 * 1024 * 1024     # == v7x scoped default; needed on v5e (16 MiB default)


def _round_up(x, m):
    return ((x + m - 1) // m) * m


def prepare_c6ab(c6ab):
    """One-time re-layout of the D3 c6ab table into kernel-friendly order.

    (MAXZ, MAXZ, 5, 5, 3) -> (3*25, MAXZ*MAXZ), so that a single `jnp.take`
    along axis 1 in the forward pass emits the per-pair tables already in the
    (3, 25, n_pairs) layout K2 consumes — no post-gather pad / transpose passes
    over pair-sized arrays.
    """
    maxz = c6ab.shape[0]
    t = jnp.transpose(c6ab.astype(jnp.float32).reshape(maxz, maxz, D3_MAXC2, 3),
                      (3, 2, 0, 1))                     # (3, 25, MAXZ, MAXZ)
    return t.reshape(3 * D3_MAXC2, maxz * maxz)


# --------------------------------------------------------------------------
# shared helper: one-hot segment-sum on the MXU (resident atom row)
# --------------------------------------------------------------------------
def _segment_sum_into_row(vals, idx_row, out_ref, atom_chunk):
    """out_ref(1, N_pad) += scatter-add of vals(1, PT) at atom ids idx_row(1, PT).

    Sequence of (1, PT) x (PT, NT) MXU matmuls against a one-hot mask built
    per NT-sized atom chunk.  The (NT, PT) iota is built once per invocation;
    the chunk offset is subtracted from the cheap (1, PT) index row instead of
    being added to the full (NT, PT) iota.
    """
    n_pad = out_ref.shape[-1]
    pt = vals.shape[-1]
    iota = lax.broadcasted_iota(jnp.int32, (atom_chunk, pt), 0)
    for nb in range(n_pad // atom_chunk):               # trace-time constant
        base = nb * atom_chunk
        onehot_t = (iota == (idx_row - base)).astype(jnp.float32)   # (NT, PT)
        out_ref[:, base:base + atom_chunk] += lax.dot_general(
            vals, onehot_t,
            dimension_numbers=(((1,), (1,)), ((), ())),
            preferred_element_type=jnp.float32)                      # (1, NT)


# --------------------------------------------------------------------------
# K1: coordination numbers  (damping sigmoid + segment-sum over idx_i)
# --------------------------------------------------------------------------
def _nc_kernel(r_ref, rco_ref, idx_ref, nc_ref, *, atom_chunk):
    @pl.when(pl.program_id(1) == 0)
    def _init():
        nc_ref[...] = jnp.zeros_like(nc_ref)

    rr = rco_ref[...] / r_ref[...]                                   # (1, PT)
    damp = 1.0 / (1.0 + jnp.exp(-D3_K1 * (rr - 1.0)))                # (1, PT)
    _segment_sum_into_row(damp, idx_ref[...], nc_ref, atom_chunk)


# --------------------------------------------------------------------------
# K2: per-pair dispersion energy (sublane-dense pair layout)
# --------------------------------------------------------------------------
def _pair_energy_kernel(r_ref, r2r4_ref, nci_ref, ncj_ref, tab_ref, e_ref):
    r = r_ref[...]                                                   # (S, 128)
    nci = nci_ref[...]
    ncj = ncj_ref[...]

    # tab_ref is (3, 25, S, 128): cn0/cn1/cn2 with the 25 CN reference points
    # on the leading axis, so every softmax reduction is a leading-axis (VPU)
    # reduction — no XLU, no MXU, no padded sentinel rows.
    cn0 = tab_ref[0]
    cn1 = tab_ref[1]
    cn2 = tab_ref[2]

    rdist = (cn1 - nci[None]) ** 2 + (cn2 - ncj[None]) ** 2          # (25,S,128)
    logits = D3_K3 * rdist
    m = jnp.max(logits, axis=0)                                      # (S, 128)
    w = jnp.exp(logits - m[None])                                    # (25,S,128)
    wsum = jnp.sum(w, axis=0)                                        # (S, 128)
    # Exact f32 divide kept (pl.reciprocal(approx=True) risks the accuracy
    # target); same for the sqrt/divide below to match the reference formula
    # bit-for-bit in structure (real c6ab tables can have c6 ~ 0 entries).
    c6 = jnp.sum(w * cn0, axis=0) / wsum                             # (S, 128)

    c8 = 3.0 * c6 * r2r4_ref[...]
    r2 = r * r
    r6 = r2 * r2 * r2
    r8 = r6 * r2
    tmp = D3_A1 * jnp.sqrt(c8 / (c6 + EPS) + EPS) + D3_A2
    tmp2 = tmp * tmp
    tmp6 = tmp2 * tmp2 * tmp2
    tmp8 = tmp6 * tmp2
    e6 = -0.5 * D3_S6 * c6 / (r6 + tmp6)
    e8 = -0.5 * D3_S8 * c8 / (r8 + tmp8)
    e_ref[...] = e6 + e8


# --------------------------------------------------------------------------
# K3: per-atom energy  (segment-sum of pair energies over idx_i)
# --------------------------------------------------------------------------
def _esum_kernel(e_ref, idx_ref, out_ref, *, atom_chunk):
    @pl.when(pl.program_id(1) == 0)
    def _init():
        out_ref[...] = jnp.zeros_like(out_ref)

    _segment_sum_into_row(e_ref[...], idx_ref[...], out_ref, atom_chunk)


# --------------------------------------------------------------------------
# wrapper
# --------------------------------------------------------------------------
def disp_layer_forward(Z, r, idx_i, idx_j, c6ab_flat, rcov, r2r4,
                       *, pair_tile_k2=4096, pair_tile_seg=2048, atom_tile=256):
    """JAX/Pallas equivalent of DispLayer.forward (cutoff=None, c6_version=2).

    `c6ab_flat` must be the output of `prepare_c6ab(c6ab)` (done once at init).
    """
    N = Z.shape[0]
    P = r.shape[0]
    MAXZ = rcov.shape[0]

    # ---------------- static tiling ----------------
    P128 = _round_up(P, LANES)
    PT_seg = min(pair_tile_seg, P128)                   # K1/K3 pair tile
    PT_k2 = _round_up(min(pair_tile_k2, P128), PT_seg)  # K2 pair tile (PT_seg | PT_k2)
    P_pad = _round_up(P, PT_k2)                         # single padded pair length
    # v7x: keep >= 2 "parallel" K2 tiles / an even K1-K3 tile count when the
    # system is big enough so both TensorCores get work (no-op on v5e/v6e).
    if P_pad // PT_k2 < 2 and PT_k2 >= 2048:
        PT_k2 //= 2
    if P_pad // PT_seg < 2 and PT_seg >= 2048:
        PT_seg //= 2
    S_all = P_pad // LANES
    S_T2 = PT_k2 // LANES
    n_pt_k2 = P_pad // PT_k2
    n_pt_seg = P_pad // PT_seg
    n_split = 2 if (n_pt_seg >= 2 and n_pt_seg % 2 == 0) else 1
    n_pt_half = n_pt_seg // n_split

    NT = min(atom_tile, _round_up(N, LANES))            # atom chunk (one-hot)
    N_pad = _round_up(N, NT)
    pad_p = P_pad - P

    # ---------------- XLA glue: padding + table gathers ----------------
    idx_i = idx_i.astype(jnp.int32)
    idx_j = idx_j.astype(jnp.int32)
    # Padded pair slots get segment id == N: they never match a real atom
    # column of the one-hot (columns >= N are sliced off at the end), so their
    # (finite) contributions are dropped.  Do NOT change this pad index without
    # re-checking the nci/ncj clamp below (when N == N_pad the clamp reads a
    # real atom's nc, which is harmless only because K3 drops padded pairs).
    idx_i_p = jnp.pad(idx_i, (0, pad_p), constant_values=N)
    idx_j_p = jnp.pad(idx_j, (0, pad_p), constant_values=N)
    r_p = jnp.pad(r.astype(jnp.float32), (0, pad_p), constant_values=1.0)

    gi = jnp.clip(idx_i_p, 0, N - 1)
    gj = jnp.clip(idx_j_p, 0, N - 1)
    Zi = Z[gi]
    Zj = Z[gj]
    rco = (rcov[Zi] + rcov[Zj]).astype(jnp.float32)                    # (P_pad,)
    r2r4_ij = (r2r4[Zi] * r2r4[Zj]).astype(jnp.float32)                # (P_pad,)
    # Single gather from the pre-transposed table -> tables already in kernel
    # layout; the reshape below is contiguous (free).
    tab = jnp.take(c6ab_flat, Zi * MAXZ + Zj, axis=1)                  # (75, P_pad)
    tab_k = tab.reshape(3, D3_MAXC2, S_all, LANES)

    r_row = r_p.reshape(1, P_pad)
    rco_row = rco.reshape(1, P_pad)
    idx_row = idx_i_p.reshape(1, P_pad)

    seg_pair_spec = pl.BlockSpec((1, PT_seg), lambda c, p: (0, c * n_pt_half + p))
    seg_out_spec = pl.BlockSpec((None, 1, N_pad), lambda c, p: (c, 0, 0))
    seg_params = pltpu.CompilerParams(
        dimension_semantics=("parallel", "arbitrary"),
        vmem_limit_bytes=VMEM_LIMIT)

    # ---------------- K1: coordination numbers ----------------
    nc_parts = pl.pallas_call(
        functools.partial(_nc_kernel, atom_chunk=NT),
        out_shape=jax.ShapeDtypeStruct((n_split, 1, N_pad), jnp.float32),
        grid=(n_split, n_pt_half),
        in_specs=[seg_pair_spec, seg_pair_spec, seg_pair_spec],
        out_specs=seg_out_spec,
        compiler_params=seg_params,
    )(r_row, rco_row, idx_row)
    nc_flat = jnp.sum(nc_parts, axis=0).reshape(N_pad)

    # ---------------- glue: nci / ncj gathers ----------------
    nci = nc_flat[jnp.minimum(idx_i_p, N_pad - 1)]                     # (P_pad,)
    ncj = nc_flat[jnp.minimum(idx_j_p, N_pad - 1)]                     # (P_pad,)

    r_2d = r_p.reshape(S_all, LANES)
    r2r4_2d = r2r4_ij.reshape(S_all, LANES)
    nci_2d = nci.reshape(S_all, LANES)
    ncj_2d = ncj.reshape(S_all, LANES)

    # ---------------- K2: per-pair dispersion energy ----------------
    pair_spec = pl.BlockSpec((S_T2, LANES), lambda p: (p, 0))
    table_spec = pl.BlockSpec((3, D3_MAXC2, S_T2, LANES), lambda p: (0, 0, p, 0))
    e_2d = pl.pallas_call(
        _pair_energy_kernel,
        out_shape=jax.ShapeDtypeStruct((S_all, LANES), jnp.float32),
        grid=(n_pt_k2,),
        in_specs=[pair_spec, pair_spec, pair_spec, pair_spec, table_spec],
        out_specs=pl.BlockSpec((S_T2, LANES), lambda p: (p, 0)),
        compiler_params=pltpu.CompilerParams(
            dimension_semantics=("parallel",),
            vmem_limit_bytes=VMEM_LIMIT),
    )(r_2d, r2r4_2d, nci_2d, ncj_2d, tab_k)

    # ---------------- K3: per-atom energy segment sum ----------------
    e_row = e_2d.reshape(1, P_pad)                       # contiguous, free
    e_parts = pl.pallas_call(
        functools.partial(_esum_kernel, atom_chunk=NT),
        out_shape=jax.ShapeDtypeStruct((n_split, 1, N_pad), jnp.float32),
        grid=(n_split, n_pt_half),
        in_specs=[seg_pair_spec, seg_pair_spec],
        out_specs=seg_out_spec,
        compiler_params=seg_params,
    )(e_row, idx_row)

    return jnp.sum(e_parts, axis=0).reshape(N_pad)[:N]


# --------------------------------------------------------------------------
# pure-JAX reference (matches the PyTorch edisp, cutoff=None, c6_version=2)
# --------------------------------------------------------------------------
def edisp_reference(Z, r, idx_i, idx_j, c6ab, rcov, r2r4, n_atoms):
    Zi = Z[idx_i]
    Zj = Z[idx_j]
    rco = rcov[Zi] + rcov[Zj]
    rr = rco / r
    damp = 1.0 / (1.0 + jnp.exp(-D3_K1 * (rr - 1.0)))
    nc = jax.ops.segment_sum(damp, idx_i, num_segments=n_atoms)
    nci = nc[idx_i]
    ncj = nc[idx_j]
    c6ab_p = c6ab[Zi, Zj].reshape(-1, D3_MAXC2, 3)
    rdist = (c6ab_p[:, :, 1] - nci[:, None]) ** 2 + (c6ab_p[:, :, 2] - ncj[:, None]) ** 2
    w = jax.nn.softmax(D3_K3 * rdist, axis=1)
    c6 = jnp.sum(w * c6ab_p[:, :, 0], axis=1)
    c8 = 3.0 * c6 * r2r4[Zi] * r2r4[Zj]
    r2 = r * r
    r6 = r2 ** 3
    r8 = r6 * r2
    tmp = D3_A1 * jnp.sqrt(c8 / (c6 + EPS) + EPS) + D3_A2
    tmp2 = tmp ** 2
    tmp6 = tmp2 ** 3
    tmp8 = tmp6 * tmp2
    e6 = -0.5 * D3_S6 * c6 / (r6 + tmp6)
    e8 = -0.5 * D3_S8 * c8 / (r8 + tmp8)
    return jax.ops.segment_sum(e6 + e8, idx_i, num_segments=n_atoms)


if __name__ == "__main__":
    key = jax.random.PRNGKey(0)
    k_rcov, k_r2r4, k_c6a, k_c6b, k_z, k_pos = jax.random.split(key, 6)

    # Synthetic (deterministic) D3 parameter tables — the original module loads
    # them from .npy files; shapes preserved with a small max atomic number.
    MAXZ = 10
    rcov = jax.random.uniform(k_rcov, (MAXZ,), jnp.float32, 0.5, 2.0)
    r2r4 = jax.random.uniform(k_r2r4, (MAXZ,), jnp.float32, 1.0, 8.0)
    c6_ref = jax.random.uniform(k_c6a, (MAXZ, MAXZ, D3_MAXC, D3_MAXC, 1),
                                jnp.float32, 1.0, 50.0)
    cn_ref = jax.random.uniform(k_c6b, (MAXZ, MAXZ, D3_MAXC, D3_MAXC, 2),
                                jnp.float32, 0.0, 5.0)
    c6ab = jnp.concatenate([c6_ref, cn_ref], axis=-1)   # (MAXZ, MAXZ, 5, 5, 3)
    # TODO(synk): d3_r0ab table is stored by the torch module but unused in forward.

    # Small molecular graph: 8 atoms, all ordered pairs i != j (56 pairs).
    n_atoms = 8
    Z = jax.random.randint(k_z, (n_atoms,), 1, MAXZ, dtype=jnp.int32)
    pos = jax.random.uniform(k_pos, (n_atoms, 3), jnp.float32, 0.0, 6.0)
    ii, jj = jnp.meshgrid(jnp.arange(n_atoms), jnp.arange(n_atoms), indexing="ij")
    mask = ii != jj
    idx_i = ii[mask].astype(jnp.int32)
    idx_j = jj[mask].astype(jnp.int32)
    r = jnp.linalg.norm(pos[idx_i] - pos[idx_j], axis=-1) + 1.0  # bohr, > 0

    c6ab_flat = prepare_c6ab(c6ab)                       # one-time re-layout
    run = jax.jit(functools.partial(disp_layer_forward,
                                    c6ab_flat=c6ab_flat, rcov=rcov, r2r4=r2r4))
    e_atom = run(Z, r, idx_i, idx_j)
    jax.block_until_ready(e_atom)

    e_ref_out = edisp_reference(Z, r, idx_i, idx_j, c6ab, rcov, r2r4, n_atoms)
    assert e_atom.shape == (n_atoms,)
    assert jnp.allclose(e_atom, e_ref_out, rtol=5e-4, atol=1e-6), (e_atom, e_ref_out)

    print("KERNEL_OK")
</pallas_src>

<mosaic_0001>
module attributes {stable_mosaic.version = 11 : i64} {
  func.func @_pair_energy_kernel(%arg0: i32, %arg1: memref<1x128xf32, #tpu.memory_space<vmem>>, %arg2: memref<1x128xf32, #tpu.memory_space<vmem>>, %arg3: memref<1x128xf32, #tpu.memory_space<vmem>>, %arg4: memref<1x128xf32, #tpu.memory_space<vmem>>, %arg5: memref<3x25x1x128xf32, #tpu.memory_space<vmem>>, %arg6: memref<1x128xf32, #tpu.memory_space<vmem>>) attributes {dimension_semantics = [#tpu.dimension_semantics<parallel>], iteration_bounds = array<i64: 1>, scalar_prefetch = 0 : i64, scratch_operands = 0 : i64, tpu.core_type = #tpu.core_type<tc>, window_params = [{transform_indices = @transform_0, window_bounds = array<i64: 1, 128>}, {transform_indices = @transform_1, window_bounds = array<i64: 1, 128>}, {transform_indices = @transform_2, window_bounds = array<i64: 1, 128>}, {transform_indices = @transform_3, window_bounds = array<i64: 1, 128>}, {transform_indices = @transform_4, window_bounds = array<i64: 3, 25, 1, 128>}, {transform_indices = @transform_5, window_bounds = array<i64: 1, 128>}]} {
    %c0 = arith.constant 0 : index
    %c0_0 = arith.constant 0 : index
    %0 = vector.load %arg1[%c0, %c0_0] : memref<1x128xf32, #tpu.memory_space<vmem>>, vector<1x128xf32>
    %c0_1 = arith.constant 0 : index
    %c0_2 = arith.constant 0 : index
    %1 = vector.load %arg3[%c0_1, %c0_2] : memref<1x128xf32, #tpu.memory_space<vmem>>, vector<1x128xf32>
    %c0_3 = arith.constant 0 : index
    %c0_4 = arith.constant 0 : index
    %2 = vector.load %arg4[%c0_3, %c0_4] : memref<1x128xf32, #tpu.memory_space<vmem>>, vector<1x128xf32>
    %c0_5 = arith.constant 0 : index
    %c0_6 = arith.constant 0 : index
    %c0_7 = arith.constant 0 : index
    %c0_8 = arith.constant 0 : index
    %3 = vector.load %arg5[%c0_5, %c0_6, %c0_7, %c0_8] : memref<3x25x1x128xf32, #tpu.memory_space<vmem>>, vector<1x25x1x128xf32>
    %4 = vector.shape_cast %3 : vector<1x25x1x128xf32> to vector<25x1x128xf32>
    %c1 = arith.constant 1 : index
    %c0_9 = arith.constant 0 : index
    %c0_10 = arith.constant 0 : index
    %c0_11 = arith.constant 0 : index
    %5 = vector.load %arg5[%c1, %c0_9, %c0_10, %c0_11] : memref<3x25x1x128xf32, #tpu.memory_space<vmem>>, vector<1x25x1x128xf32>
    %6 = vector.shape_cast %5 : vector<1x25x1x128xf32> to vector<25x1x128xf32>
    %c2 = arith.constant 2 : index
    %c0_12 = arith.constant 0 : index
    %c0_13 = arith.constant 0 : index
    %c0_14 = arith.constant 0 : index
    %7 = vector.load %arg5[%c2, %c0_12, %c0_13, %c0_14] : memref<3x25x1x128xf32, #tpu.memory_space<vmem>>, vector<1x25x1x128xf32>
    %8 = vector.shape_cast %7 : vector<1x25x1x128xf32> to vector<25x1x128xf32>
    %9 = vector.shape_cast %1 : vector<1x128xf32> to vector<1x1x128xf32>
    %10 = vector.broadcast %9 : vector<1x1x128xf32> to vector<25x1x128xf32>
    %11 = arith.subf %6, %10 : vector<25x1x128xf32>
    %12 = arith.mulf %11, %11 : vector<25x1x128xf32>
    %13 = vector.shape_cast %2 : vector<1x128xf32> to vector<1x1x128xf32>
    %14 = vector.broadcast %13 : vector<1x1x128xf32> to vector<25x1x128xf32>
    %15 = arith.subf %8, %14 : vector<25x1x128xf32>
    %16 = arith.mulf %15, %15 : vector<25x1x128xf32>
    %17 = arith.addf %12, %16 : vector<25x1x128xf32>
    %cst = arith.constant -4.000000e+00 : f32
    %18 = vector.broadcast %cst : f32 to vector<25x1x128xf32>
    %19 = arith.mulf %18, %17 : vector<25x1x128xf32>
    %cst_15 = arith.constant dense<0xFF800000> : vector<1x128xf32>
    %20 = vector.multi_reduction <maximumf>, %19, %cst_15 [0] : vector<25x1x128xf32> to vector<1x128xf32>
    %21 = vector.shape_cast %20 : vector<1x128xf32> to vector<1x1x128xf32>
    %22 = vector.broadcast %21 : vector<1x1x128xf32> to vector<25x1x128xf32>
    %23 = arith.subf %19, %22 : vector<25x1x128xf32>
    %24 = math.exp %23 : vector<25x1x128xf32>
    %cst_16 = arith.constant dense<0.000000e+00> : vector<1x128xf32>
    %25 = vector.multi_reduction <add>, %24, %cst_16 [0] : vector<25x1x128xf32> to vector<1x128xf32>
    %26 = arith.mulf %24, %4 : vector<25x1x128xf32>
    %cst_17 = arith.constant dense<0.000000e+00> : vector<1x128xf32>
    %27 = vector.multi_reduction <add>, %26, %cst_17 [0] : vector<25x1x128xf32> to vector<1x128xf32>
    %28 = arith.divf %27, %25 : vector<1x128xf32>
    %cst_18 = arith.constant 3.000000e+00 : f32
    %29 = vector.broadcast %cst_18 : f32 to vector<1x128xf32>
    %30 = arith.mulf %29, %28 : vector<1x128xf32>
    %c0_19 = arith.constant 0 : index
    %c0_20 = arith.constant 0 : index
    %31 = vector.load %arg2[%c0_19, %c0_20] : memref<1x128xf32, #tpu.memory_space<vmem>>, vector<1x128xf32>
    %32 = arith.mulf %30, %31 : vector<1x128xf32>
    %33 = arith.mulf %0, %0 : vector<1x128xf32>
    %34 = arith.mulf %33, %33 : vector<1x128xf32>
    %35 = arith.mulf %34, %33 : vector<1x128xf32>
    %36 = arith.mulf %35, %33 : vector<1x128xf32>
    %cst_21 = arith.constant 1.000000e-10 : f32
    %37 = vector.broadcast %cst_21 : f32 to vector<1x128xf32>
    %38 = arith.addf %28, %37 : vector<1x128xf32>
    %39 = arith.divf %32, %38 : vector<1x128xf32>
    %cst_22 = arith.constant 1.000000e-10 : f32
    %40 = vector.broadcast %cst_22 : f32 to vector<1x128xf32>
    %41 = arith.addf %39, %40 : vector<1x128xf32>
    %42 = math.sqrt %41 : vector<1x128xf32>
    %cst_23 = arith.constant 3.385000e-01 : f32
    %43 = vector.broadcast %cst_23 : f32 to vector<1x128xf32>
    %44 = arith.mulf %43, %42 : vector<1x128xf32>
    %cst_24 = arith.constant 2.883000e+00 : f32
    %45 = vector.broadcast %cst_24 : f32 to vector<1x128xf32>
    %46 = arith.addf %44, %45 : vector<1x128xf32>
    %47 = arith.mulf %46, %46 : vector<1x128xf32>
    %48 = arith.mulf %47, %47 : vector<1x128xf32>
    %49 = arith.mulf %48, %47 : vector<1x128xf32>
    %50 = arith.mulf %49, %47 : vector<1x128xf32>
    %cst_25 = arith.constant -5.000000e-01 : f32
    %51 = vector.broadcast %cst_25 : f32 to vector<1x128xf32>
    %52 = arith.mulf %51, %28 : vector<1x128xf32>
    %53 = arith.addf %35, %49 : vector<1x128xf32>
    %54 = arith.divf %52, %53 : vector<1x128xf32>
    %cst_26 = arith.constant -4.585500e-01 : f32
    %55 = vector.broadcast %cst_26 : f32 to vector<1x128xf32>
    %56 = arith.mulf %55, %32 : vector<1x128xf32>
    %57 = arith.addf %36, %50 : vector<1x128xf32>
    %58 = arith.divf %56, %57 : vector<1x128xf32>
    %59 = arith.addf %54, %58 : vector<1x128xf32>
    %c0_27 = arith.constant 0 : index
    %c0_28 = arith.constant 0 : index
    %60 = vector.load %arg6[%c0_27, %c0_28] : memref<1x128xf32, #tpu.memory_space<vmem>>, vector<1x128xf32>
    tpu.vector_store %arg6[%c0_27, %c0_28], %59 {strides = array<i32>} : memref<1x128xf32, #tpu.memory_space<vmem>>, vector<1x128xf32>,
    return
  }
  func.func @transform_0(%arg0: i32) -> (i32, i32) {
    %c0_i32 = arith.constant 0 : i32
    %c0_i32_0 = arith.constant 0 : i32
    return %arg0, %c0_i32 : i32, i32
  }
  func.func @transform_1(%arg0: i32) -> (i32, i32) {
    %c0_i32 = arith.constant 0 : i32
    %c0_i32_0 = arith.constant 0 : i32
    return %arg0, %c0_i32 : i32, i32
  }
  func.func @transform_2(%arg0: i32) -> (i32, i32) {
    %c0_i32 = arith.constant 0 : i32
    %c0_i32_0 = arith.constant 0 : i32
    return %arg0, %c0_i32 : i32, i32
  }
  func.func @transform_3(%arg0: i32) -> (i32, i32) {
    %c0_i32 = arith.constant 0 : i32
    %c0_i32_0 = arith.constant 0 : i32
    return %arg0, %c0_i32 : i32, i32
  }
  func.func @transform_4(%arg0: i32) -> (i32, i32, i32, i32) {
    %c0_i32 = arith.constant 0 : i32
    %c0_i32_0 = arith.constant 0 : i32
    %c0_i32_1 = arith.constant 0 : i32
    %c0_i32_2 = arith.constant 0 : i32
    return %c0_i32, %c0_i32_0, %arg0, %c0_i32_1 : i32, i32, i32, i32
  }
  func.func @transform_5(%arg0: i32) -> (i32, i32) {
    %c0_i32 = arith.constant 0 : i32
    %c0_i32_0 = arith.constant 0 : i32
    return %arg0, %c0_i32 : i32, i32
  }
}

module attributes {stable_mosaic.version = 11 : i64} {
  func.func @_nc_kernel(%arg0: i32, %arg1: i32, %arg2: memref<1x128xf32, #tpu.memory_space<vmem>>, %arg3: memref<1x128xf32, #tpu.memory_space<vmem>>, %arg4: memref<1x128xi32, #tpu.memory_space<vmem>>, %arg5: memref<1x1x128xf32, #tpu.memory_space<vmem>>) attributes {dimension_semantics = [#tpu.dimension_semantics<parallel>, #tpu.dimension_semantics<arbitrary>], iteration_bounds = array<i64: 1, 1>, scalar_prefetch = 0 : i64, scratch_operands = 0 : i64, tpu.core_type = #tpu.core_type<tc>, window_params = [{transform_indices = @transform_0, window_bounds = array<i64: 1, 128>}, {transform_indices = @transform_1, window_bounds = array<i64: 1, 128>}, {transform_indices = @transform_2, window_bounds = array<i64: 1, 128>}, {transform_indices = @transform_3, window_bounds = array<i64: 1, 1, 128>}]} {
    %c0_i32 = arith.constant 0 : i32
    %0 = arith.cmpi eq, %arg1, %c0_i32 : i32
    %1 = arith.extui %0 : i1 to i32
    %c0_i32_0 = arith.constant 0 : i32
    %2 = arith.cmpi ne, %1, %c0_i32_0 : i32
    scf.if %2 {
      %cst_17 = arith.constant 0.000000e+00 : f32
      %30 = vector.broadcast %cst_17 : f32 to vector<1x128xf32>
      %c0_18 = arith.constant 0 : index
      %c0_19 = arith.constant 0 : index
      %c0_20 = arith.constant 0 : index
      %31 = vector.load %arg5[%c0_18, %c0_19, %c0_20] : memref<1x1x128xf32, #tpu.memory_space<vmem>>, vector<1x1x128xf32>
      %32 = vector.shape_cast %31 : vector<1x1x128xf32> to vector<1x128xf32>
      %33 = vector.shape_cast %30 : vector<1x128xf32> to vector<1x1x128xf32>
      tpu.vector_store %arg5[%c0_18, %c0_19, %c0_20], %33 {strides = array<i32>} : memref<1x1x128xf32, #tpu.memory_space<vmem>>, vector<1x1x128xf32>,
    } else {
    }
    %c0 = arith.constant 0 : index
    %c0_1 = arith.constant 0 : index
    %3 = vector.load %arg3[%c0, %c0_1] : memref<1x128xf32, #tpu.memory_space<vmem>>, vector<1x128xf32>
    %c0_2 = arith.constant 0 : index
    %c0_3 = arith.constant 0 : index
    %4 = vector.load %arg2[%c0_2, %c0_3] : memref<1x128xf32, #tpu.memory_space<vmem>>, vector<1x128xf32>
    %5 = arith.divf %3, %4 : vector<1x128xf32>
    %cst = arith.constant 1.000000e+00 : f32
    %6 = vector.broadcast %cst : f32 to vector<1x128xf32>
    %7 = arith.subf %5, %6 : vector<1x128xf32>
    %cst_4 = arith.constant -1.600000e+01 : f32
    %8 = vector.broadcast %cst_4 : f32 to vector<1x128xf32>
    %9 = arith.mulf %8, %7 : vector<1x128xf32>
    %10 = math.exp %9 : vector<1x128xf32>
    %cst_5 = arith.constant 1.000000e+00 : f32
    %11 = vector.broadcast %cst_5 : f32 to vector<1x128xf32>
    %12 = arith.addf %11, %10 : vector<1x128xf32>
    %cst_6 = arith.constant 1.000000e+00 : f32
    %13 = vector.broadcast %cst_6 : f32 to vector<1x128xf32>
    %14 = arith.divf %13, %12 : vector<1x128xf32>
    %c0_7 = arith.constant 0 : index
    %c0_8 = arith.constant 0 : index
    %15 = vector.load %arg4[%c0_7, %c0_8] : memref<1x128xi32, #tpu.memory_space<vmem>>, vector<1x128xi32>
    %16 = tpu.iota {dimensions = array<i32: 0>} : vector<128x128xi32>
    %c0_i32_9 = arith.constant 0 : i32
    %17 = vector.broadcast %c0_i32_9 : i32 to vector<1x128xi32>
    %18 = arith.subi %15, %17 : vector<1x128xi32>
    %19 = vector.broadcast %18 : vector<1x128xi32> to vector<128x128xi32>
    %20 = arith.cmpi eq, %16, %19 : vector<128x128xi32>
    %21 = arith.extui %20 : vector<128x128xi1> to vector<128x128xi32>
    %22 = arith.sitofp %21 : vector<128x128xi32> to vector<128x128xf32>
    %c0_10 = arith.constant 0 : index
    %c0_11 = arith.constant 0 : index
    %c0_12 = arith.constant 0 : index
    %23 = vector.load %arg5[%c0_10, %c0_11, %c0_12] : memref<1x1x128xf32, #tpu.memory_space<vmem>>, vector<1x1x128xf32>
    %24 = vector.shape_cast %23 : vector<1x1x128xf32> to vector<1x128xf32>
    %cst_13 = arith.constant dense<0.000000e+00> : vector<1x128xf32>
    %25 = tpu.matmul %14, %22, %cst_13 {dimension_numbers = #tpu.dot_dimension_numbers<[1], [1], [0], [0], [0, 0, 1, 0], [], []>} : vector<1x128xf32>, vector<128x128xf32>, vector<1x128xf32> -> vector<1x128xf32>
    %26 = arith.addf %24, %25 : vector<1x128xf32>
    %c0_14 = arith.constant 0 : index
    %c0_15 = arith.constant 0 : index
    %c0_16 = arith.constant 0 : index
    %27 = vector.load %arg5[%c0_14, %c0_15, %c0_16] : memref<1x1x128xf32, #tpu.memory_space<vmem>>, vector<1x1x128xf32>
    %28 = vector.shape_cast %27 : vector<1x1x128xf32> to vector<1x128xf32>
    %29 = vector.shape_cast %26 : vector<1x128xf32> to vector<1x1x128xf32>
    tpu.vector_store %arg5[%c0_14, %c0_15, %c0_16], %29 {strides = array<i32>} : memref<1x1x128xf32, #tpu.memory_space<vmem>>, vector<1x1x128xf32>,
    return
  }
  func.func @transform_0(%arg0: i32, %arg1: i32) -> (i32, i32) {
    %c1_i32 = arith.constant 1 : i32
    %0 = arith.muli %arg0, %c1_i32 : i32
    %1 = arith.addi %0, %arg1 : i32
    %c0_i32 = arith.constant 0 : i32
    %c0_i32_0 = arith.constant 0 : i32
    return %c0_i32, %1 : i32, i32
  }
  func.func @transform_1(%arg0: i32, %arg1: i32) -> (i32, i32) {
    %c1_i32 = arith.constant 1 : i32
    %0 = arith.muli %arg0, %c1_i32 : i32
    %1 = arith.addi %0, %arg1 : i32
    %c0_i32 = arith.constant 0 : i32
    %c0_i32_0 = arith.constant 0 : i32
    return %c0_i32, %1 : i32, i32
  }
  func.func @transform_2(%arg0: i32, %arg1: i32) -> (i32, i32) {
    %c1_i32 = arith.constant 1 : i32
    %0 = arith.muli %arg0, %c1_i32 : i32
    %1 = arith.addi %0, %arg1 : i32
    %c0_i32 = arith.constant 0 : i32
    %c0_i32_0 = arith.constant 0 : i32
    return %c0_i32, %1 : i32, i32
  }
  func.func @transform_3(%arg0: i32, %arg1: i32) -> (i32, i32, i32) {
    %c0_i32 = arith.constant 0 : i32
    %c0_i32_0 = arith.constant 0 : i32
    %c0_i32_1 = arith.constant 0 : i32
    return %arg0, %c0_i32, %c0_i32_0 : i32, i32, i32
  }
}

module attributes {stable_mosaic.version = 11 : i64} {
  func.func @_esum_kernel(%arg0: i32, %arg1: i32, %arg2: memref<1x128xf32, #tpu.memory_space<vmem>>, %arg3: memref<1x128xi32, #tpu.memory_space<vmem>>, %arg4: memref<1x1x128xf32, #tpu.memory_space<vmem>>) attributes {dimension_semantics = [#tpu.dimension_semantics<parallel>, #tpu.dimension_semantics<arbitrary>], iteration_bounds = array<i64: 1, 1>, scalar_prefetch = 0 : i64, scratch_operands = 0 : i64, tpu.core_type = #tpu.core_type<tc>, window_params = [{transform_indices = @transform_0, window_bounds = array<i64: 1, 128>}, {transform_indices = @transform_1, window_bounds = array<i64: 1, 128>}, {transform_indices = @transform_2, window_bounds = array<i64: 1, 1, 128>}]} {
    %c0_i32 = arith.constant 0 : i32
    %0 = arith.cmpi eq, %arg1, %c0_i32 : i32
    %1 = arith.extui %0 : i1 to i32
    %c0_i32_0 = arith.constant 0 : i32
    %2 = arith.cmpi ne, %1, %c0_i32_0 : i32
    scf.if %2 {
      %cst_11 = arith.constant 0.000000e+00 : f32
      %19 = vector.broadcast %cst_11 : f32 to vector<1x128xf32>
      %c0_12 = arith.constant 0 : index
      %c0_13 = arith.constant 0 : index
      %c0_14 = arith.constant 0 : index
      %20 = vector.load %arg4[%c0_12, %c0_13, %c0_14] : memref<1x1x128xf32, #tpu.memory_space<vmem>>, vector<1x1x128xf32>
      %21 = vector.shape_cast %20 : vector<1x1x128xf32> to vector<1x128xf32>
      %22 = vector.shape_cast %19 : vector<1x128xf32> to vector<1x1x128xf32>
      tpu.vector_store %arg4[%c0_12, %c0_13, %c0_14], %22 {strides = array<i32>} : memref<1x1x128xf32, #tpu.memory_space<vmem>>, vector<1x1x128xf32>,
    } else {
    }
    %c0 = arith.constant 0 : index
    %c0_1 = arith.constant 0 : index
    %3 = vector.load %arg2[%c0, %c0_1] : memref<1x128xf32, #tpu.memory_space<vmem>>, vector<1x128xf32>
    %c0_2 = arith.constant 0 : index
    %c0_3 = arith.constant 0 : index
    %4 = vector.load %arg3[%c0_2, %c0_3] : memref<1x128xi32, #tpu.memory_space<vmem>>, vector<1x128xi32>
    %5 = tpu.iota {dimensions = array<i32: 0>} : vector<128x128xi32>
    %c0_i32_4 = arith.constant 0 : i32
    %6 = vector.broadcast %c0_i32_4 : i32 to vector<1x128xi32>
    %7 = arith.subi %4, %6 : vector<1x128xi32>
    %8 = vector.broadcast %7 : vector<1x128xi32> to vector<128x128xi32>
    %9 = arith.cmpi eq, %5, %8 : vector<128x128xi32>
    %10 = arith.extui %9 : vector<128x128xi1> to vector<128x128xi32>
    %11 = arith.sitofp %10 : vector<128x128xi32> to vector<128x128xf32>
    %c0_5 = arith.constant 0 : index
    %c0_6 = arith.constant 0 : index
    %c0_7 = arith.constant 0 : index
    %12 = vector.load %arg4[%c0_5, %c0_6, %c0_7] : memref<1x1x128xf32, #tpu.memory_space<vmem>>, vector<1x1x128xf32>
    %13 = vector.shape_cast %12 : vector<1x1x128xf32> to vector<1x128xf32>
    %cst = arith.constant dense<0.000000e+00> : vector<1x128xf32>
    %14 = tpu.matmul %3, %11, %cst {dimension_numbers = #tpu.dot_dimension_numbers<[1], [1], [0], [0], [0, 0, 1, 0], [], []>} : vector<1x128xf32>, vector<128x128xf32>, vector<1x128xf32> -> vector<1x128xf32>
    %15 = arith.addf %13, %14 : vector<1x128xf32>
    %c0_8 = arith.constant 0 : index
    %c0_9 = arith.constant 0 : index
    %c0_10 = arith.constant 0 : index
    %16 = vector.load %arg4[%c0_8, %c0_9, %c0_10] : memref<1x1x128xf32, #tpu.memory_space<vmem>>, vector<1x1x128xf32>
    %17 = vector.shape_cast %16 : vector<1x1x128xf32> to vector<1x128xf32>
    %18 = vector.shape_cast %15 : vector<1x128xf32> to vector<1x1x128xf32>
    tpu.vector_store %arg4[%c0_8, %c0_9, %c0_10], %18 {strides = array<i32>} : memref<1x1x128xf32, #tpu.memory_space<vmem>>, vector<1x1x128xf32>,
    return
  }
  func.func @transform_0(%arg0: i32, %arg1: i32) -> (i32, i32) {
    %c1_i32 = arith.constant 1 : i32
    %0 = arith.muli %arg0, %c1_i32 : i32
    %1 = arith.addi %0, %arg1 : i32
    %c0_i32 = arith.constant 0 : i32
    %c0_i32_0 = arith.constant 0 : i32
    return %c0_i32, %1 : i32, i32
  }
  func.func @transform_1(%arg0: i32, %arg1: i32) -> (i32, i32) {
    %c1_i32 = arith.constant 1 : i32
    %0 = arith.muli %arg0, %c1_i32 : i32
    %1 = arith.addi %0, %arg1 : i32
    %c0_i32 = arith.constant 0 : i32
    %c0_i32_0 = arith.constant 0 : i32
    return %c0_i32, %1 : i32, i32
  }
  func.func @transform_2(%arg0: i32, %arg1: i32) -> (i32, i32, i32) {
    %c0_i32 = arith.constant 0 : i32
    %c0_i32_0 = arith.constant 0 : i32
    %c0_i32_1 = arith.constant 0 : i32
    return %arg0, %c0_i32, %c0_i32_0 : i32, i32, i32
  }
}

</mosaic_0001>

<bundles_post_ra>
// kernel: disp_layer_forward.5
= control target key start
LH: loop header
LB: loop body
LE: loop exit
PB: predicated region body
PF: predicated region fallthrough
CT: control target
= control target key end

     0   :  { %v46_v0 = vlaneseq  ;;  %v286_v1 = vmov 0.0   ;;  %vm287_vm0 = vmmov 0   ;;  %v288_v6 = vmov 1.0   ;;  %s373_s1 = inlined_call_operand.vmem [shape: s32[1,128], index: 1, kind: input, shape index: {}]   ;;  %s374_s2 = inlined_call_operand.vmem [shape: f32[1,1,128], index: 2, kind: output, shape index: {}]   ;;  %s375_s0 = inlined_call_operand.vmem [shape: f32[1,128], index: 0, kind: input, shape index: {}]  }
   0x1   :  { %248 = vmatprep.subr.mxu0 %v286_v1  ;;  %280 = vmatprep.mubr.msk.f32.mxu0 %vm287_vm0, %v286_v1  ;;  %43 = vst [vmem:[%s374_s2] sm:$0x1] %v286_v1  ;;  %v315_v3 = vld [vmem:[%s373_s1] ss:$0 sm:$0xff] }
   0x2   :  { %v310_v2 = vshrl.u32 %v46_v0, 7  ;;  %v44_v20 = vld [vmem:[%s375_s0] sm:$0x1] }
   0x4   :  { %v62_v4 = vadd.s32 120, %v310_v2  ;;  %v61_v5 = vadd.s32 112, %v310_v2  ;;  %v60_v7 = vadd.s32 104, %v310_v2  ;;  %v59_v8 = vadd.s32 96, %v310_v2 }
   0x5   :  { %v58_v9 = vadd.s32 88, %v310_v2  ;;  %v57_v10 = vadd.s32 80, %v310_v2  ;;  %v56_v11 = vadd.s32 72, %v310_v2  ;;  %v55_v12 = vadd.s32 64, %v310_v2 }
   0x6   :  { %vm82_vm1 = vcmp.eq.s32.totalorder %v62_v4, %v315_v3  ;;  %vm81_vm2 = vcmp.eq.s32.totalorder %v61_v5, %v315_v3  ;;  %vm80_vm3 = vcmp.eq.s32.totalorder %v60_v7, %v315_v3  ;;  %vm79_vm4 = vcmp.eq.s32.totalorder %v59_v8, %v315_v3 }
   0x7   :  { %249 = vmatpush3.xpose.msk.msra.mxu0 %vm82_vm1, %v288_v6  ;;  %vm78_vm5 = vcmp.eq.s32.totalorder %v58_v9, %v315_v3  ;;  %vm77_vm6 = vcmp.eq.s32.totalorder %v57_v10, %v315_v3  ;;  %vm76_vm7 = vcmp.eq.s32.totalorder %v56_v11, %v315_v3  ;;  %vm75_vm8 = vcmp.eq.s32.totalorder %v55_v12, %v315_v3 }
   0x8   :  { %250 = vmatprep.subr.mxu0 %v286_v1  ;;  %v54_v13 = vadd.s32 56, %v310_v2  ;;  %v53_v14 = vadd.s32 48, %v310_v2  ;;  %v52_v15 = vadd.s32 40, %v310_v2  ;;  %v51_v16 = vadd.s32 32, %v310_v2  ;;  %v115_v21 = vld [vmem:[%s374_s2] sm:$0x1] }
   0x9   :  { %v50_v17 = vadd.s32 24, %v310_v2  ;;  %v49_v18 = vadd.s32 16, %v310_v2  ;;  %v48_v19 = vadd.s32 8, %v310_v2  ;;  %vm67_vm0 = vcmp.eq.s32.totalorder %v310_v2, %v315_v3 }
   0xa   :  { %vm74_vm9 = vcmp.eq.s32.totalorder %v54_v13, %v315_v3  ;;  %vm73_vm10 = vcmp.eq.s32.totalorder %v53_v14, %v315_v3  ;;  %vm72_vm11 = vcmp.eq.s32.totalorder %v52_v15, %v315_v3  ;;  %vm71_vm12 = vcmp.eq.s32.totalorder %v51_v16, %v315_v3 }
   0xb   :  { %251 = vmatpush3.xpose.msk.msra.mxu0 %vm81_vm2, %v288_v6  ;;  %vm70_vm13 = vcmp.eq.s32.totalorder %v50_v17, %v315_v3  ;;  %vm69_vm14 = vcmp.eq.s32.totalorder %v49_v18, %v315_v3  ;;  %vm68_vm15 = vcmp.eq.s32.totalorder %v48_v19, %v315_v3 }
   0xc   :  { %252 = vmatprep.subr.mxu0 %v286_v1 }
   0xf   :  { %253 = vmatpush3.xpose.msk.msra.mxu0 %vm80_vm3, %v288_v6 }
  0x10   :  { %254 = vmatprep.subr.mxu0 %v286_v1 }
  0x13   :  { %255 = vmatpush3.xpose.msk.msra.mxu0 %vm79_vm4, %v288_v6 }
  0x14   :  { %256 = vmatprep.subr.mxu0 %v286_v1 }
  0x17   :  { %257 = vmatpush3.xpose.msk.msra.mxu0 %vm78_vm5, %v288_v6 }
  0x18   :  { %258 = vmatprep.subr.mxu0 %v286_v1 }
  0x1b   :  { %259 = vmatpush3.xpose.msk.msra.mxu0 %vm77_vm6, %v288_v6 }
  0x1c   :  { %260 = vmatprep.subr.mxu0 %v286_v1 }
  0x1f   :  { %261 = vmatpush3.xpose.msk.msra.mxu0 %vm76_vm7, %v288_v6 }
  0x20   :  { %262 = vmatprep.subr.mxu0 %v286_v1 }
  0x23   :  { %263 = vmatpush3.xpose.msk.msra.mxu0 %vm75_vm8, %v288_v6 }
  0x24   :  { %264 = vmatprep.subr.mxu0 %v286_v1 }
  0x27   :  { %265 = vmatpush3.xpose.msk.msra.mxu0 %vm74_vm9, %v288_v6 }
  0x28   :  { %266 = vmatprep.subr.mxu0 %v286_v1 }
  0x2b   :  { %267 = vmatpush3.xpose.msk.msra.mxu0 %vm73_vm10, %v288_v6 }
  0x2c   :  { %268 = vmatprep.subr.mxu0 %v286_v1 }
  0x2f   :  { %269 = vmatpush3.xpose.msk.msra.mxu0 %vm72_vm11, %v288_v6 }
  0x30   :  { %270 = vmatprep.subr.mxu0 %v286_v1 }
  0x33   :  { %271 = vmatpush3.xpose.msk.msra.mxu0 %vm71_vm12, %v288_v6 }
  0x34   :  { %272 = vmatprep.subr.mxu0 %v286_v1 }
  0x37   :  { %273 = vmatpush3.xpose.msk.msra.mxu0 %vm70_vm13, %v288_v6 }
  0x38   :  { %274 = vmatprep.subr.mxu0 %v286_v1 }
  0x3b   :  { %275 = vmatpush3.xpose.msk.msra.mxu0 %vm69_vm14, %v288_v6 }
  0x3c   :  { %276 = vmatprep.subr.mxu0 %v286_v1 }
  0x3f   :  { %277 = vmatpush3.xpose.msk.msra.mxu0 %vm68_vm15, %v288_v6 }
  0x40   :  { %278 = vmatprep.subr.mxu0 %v286_v1 }
  0x43   :  { %279 = vmatpush3.xpose.msk.msra.mxu0 %vm67_vm0, %v288_v6 }
  0x46   :  { %281 = vmatmul.mubr.f32.vlgmr.msra.gmra.mxu0 %v44_v20 }
 0x106   :  { %v182_v22 = vpop.f32.mrf.mxu0 }
 0x107   :  { %v186_v23 = vadd.f32 %v182_v22, %v115_v21 }
 0x108   :  { %v282_v24 = vpop.f32.mrf.mxu0 }
 0x109   :  { %187 = vst [vmem:[%s374_s2] sm:$0x1] %v186_v23 }

// kernel: disp_layer_forward.3
= control target key start
LH: loop header
LB: loop body
LE: loop exit
PB: predicated region body
PF: predicated region fallthrough
CT: control target
= control target key end

     0   :  { %v73_v0 = vlaneseq  ;;  %v323_v1 = vmov 0.0   ;;  %vm324_vm0 = vmmov 0   ;;  %v325_v7 = vmov 1.0   ;;  %s434_s2 = inlined_call_operand.vmem [shape: s32[1,128], index: 2, kind: input, shape index: {}]   ;;  %s435_s0 = inlined_call_operand.vmem [shape: f32[1,128], index: 0, kind: input, shape index: {}]   ;;  %s436_s3 = inlined_call_operand.vmem [shape: f32[1,1,128], index: 3, kind: output, shape index: {}]   ;;  %s437_s1 = inlined_call_operand.vmem [shape: f32[1,128], index: 1, kind: input, shape index: {}]  }
   0x1   :  { %279 = vmatprep.subr.mxu0 %v323_v1  ;;  %311 = vmatprep.mubr.msk.f32.mxu0 %vm324_vm0, %v323_v1  ;;  %v62_v2 = vld [vmem:[%s435_s0] sm:$0x1]  ;;  %60 = vst [vmem:[%s436_s3] sm:$0x1] %v323_v1 }
   0x2   :  { %v355_v3 = vshrl.u32 %v73_v0, 7  ;;  %317 = vrcp.f32 %v62_v2  ;;  %v360_v4 = vld [vmem:[%s434_s2] ss:$0 sm:$0xff] }
   0x3   :  { %v61_v11 = vld [vmem:[%s437_s1] sm:$0x1] }
   0x4   :  { %v89_v5 = vadd.s32 120, %v355_v3  ;;  %v88_v6 = vadd.s32 112, %v355_v3  ;;  %v87_v8 = vadd.s32 104, %v355_v3  ;;  %v86_v9 = vadd.s32 96, %v355_v3 }
   0x5   :  { %v85_v12 = vadd.s32 88, %v355_v3  ;;  %v84_v14 = vadd.s32 80, %v355_v3  ;;  %v83_v16 = vadd.s32 72, %v355_v3  ;;  %v82_v18 = vadd.s32 64, %v355_v3 }
   0x6   :  { %vm109_vm1 = vcmp.eq.s32.totalorder %v89_v5, %v360_v4  ;;  %vm108_vm2 = vcmp.eq.s32.totalorder %v88_v6, %v360_v4  ;;  %vm107_vm3 = vcmp.eq.s32.totalorder %v87_v8, %v360_v4  ;;  %vm106_vm4 = vcmp.eq.s32.totalorder %v86_v9, %v360_v4 }
   0x7   :  { %280 = vmatpush3.xpose.msk.msra.mxu0 %vm109_vm1, %v325_v7  ;;  %vm105_vm5 = vcmp.eq.s32.totalorder %v85_v12, %v360_v4  ;;  %vm104_vm6 = vcmp.eq.s32.totalorder %v84_v14, %v360_v4  ;;  %vm103_vm7 = vcmp.eq.s32.totalorder %v83_v16, %v360_v4  ;;  %vm102_vm8 = vcmp.eq.s32.totalorder %v82_v18, %v360_v4 }
   0x8   :  { %281 = vmatprep.subr.mxu0 %v323_v1  ;;  %v81_v20 = vadd.s32 56, %v355_v3  ;;  %v80_v21 = vadd.s32 48, %v355_v3  ;;  %v79_v22 = vadd.s32 40, %v355_v3  ;;  %v78_v23 = vadd.s32 32, %v355_v3  ;;  %v142_v30 = vld [vmem:[%s436_s3] sm:$0x1] }
   0x9   :  { %v77_v25 = vadd.s32 24, %v355_v3  ;;  %v76_v27 = vadd.s32 16, %v355_v3  ;;  %v75_v28 = vadd.s32 8, %v355_v3  ;;  %vm94_vm0 = vcmp.eq.s32.totalorder %v355_v3, %v360_v4 }
   0xa   :  { %vm101_vm9 = vcmp.eq.s32.totalorder %v81_v20, %v360_v4  ;;  %vm100_vm10 = vcmp.eq.s32.totalorder %v80_v21, %v360_v4  ;;  %vm99_vm11 = vcmp.eq.s32.totalorder %v79_v22, %v360_v4  ;;  %vm98_vm12 = vcmp.eq.s32.totalorder %v78_v23, %v360_v4 }
   0xb   :  { %282 = vmatpush3.xpose.msk.msra.mxu0 %vm108_vm2, %v325_v7  ;;  %vm97_vm13 = vcmp.eq.s32.totalorder %v77_v25, %v360_v4  ;;  %vm96_vm14 = vcmp.eq.s32.totalorder %v76_v27, %v360_v4  ;;  %vm95_vm15 = vcmp.eq.s32.totalorder %v75_v28, %v360_v4 }
   0xc   :  { %283 = vmatprep.subr.mxu0 %v323_v1 }
   0xf   :  { %v318_v10 = vpop.eup %317  ;;  %284 = vmatpush3.xpose.msk.msra.mxu0 %vm107_vm3, %v325_v7 }
  0x10   :  { %285 = vmatprep.subr.mxu0 %v323_v1  ;;  %v64_v13 = vmul.f32 %v318_v10, %v61_v11 }
  0x12   :  { %v228_v15 = vadd.f32 -1.0, %v64_v13 }
  0x13   :  { %286 = vmatpush3.xpose.msk.msra.mxu0 %vm106_vm4, %v325_v7 }
  0x14   :  { %287 = vmatprep.subr.mxu0 %v323_v1  ;;  %v66_v17 = vmul.f32 -16.0, %v228_v15 }
  0x16   :  { %v67_v19 = vmul.f32 1.442695, %v66_v17 }
  0x17   :  { %288 = vmatpush3.xpose.msk.msra.mxu0 %vm105_vm5, %v325_v7 }
  0x18   :  { %289 = vmatprep.subr.mxu0 %v323_v1  ;;  %319 = vpow2.f32 %v67_v19 }
  0x1b   :  { %290 = vmatpush3.xpose.msk.msra.mxu0 %vm104_vm6, %v325_v7 }
  0x1c   :  { %291 = vmatprep.subr.mxu0 %v323_v1 }
  0x1f   :  { %292 = vmatpush3.xpose.msk.msra.mxu0 %vm103_vm7, %v325_v7 }
  0x20   :  { %293 = vmatprep.subr.mxu0 %v323_v1 }
  0x23   :  { %294 = vmatpush3.xpose.msk.msra.mxu0 %vm102_vm8, %v325_v7 }
  0x24   :  { %295 = vmatprep.subr.mxu0 %v323_v1 }
  0x25   :  { %v320_v24 = vpop.eup %319 }
  0x26   :  { %v69_v26 = vadd.f32 1.0, %v320_v24 }
  0x27   :  { %296 = vmatpush3.xpose.msk.msra.mxu0 %vm101_vm9, %v325_v7 }
  0x28   :  { %297 = vmatprep.subr.mxu0 %v323_v1  ;;  %321 = vrcp.f32 %v69_v26 }
  0x2b   :  { %298 = vmatpush3.xpose.msk.msra.mxu0 %vm100_vm10, %v325_v7 }
  0x2c   :  { %299 = vmatprep.subr.mxu0 %v323_v1 }
  0x2f   :  { %300 = vmatpush3.xpose.msk.msra.mxu0 %vm99_vm11, %v325_v7 }
  0x30   :  { %301 = vmatprep.subr.mxu0 %v323_v1 }
  0x33   :  { %302 = vmatpush3.xpose.msk.msra.mxu0 %vm98_vm12, %v325_v7 }
  0x34   :  { %303 = vmatprep.subr.mxu0 %v323_v1 }
  0x35   :  { %v322_v29 = vpop.eup %321 }
  0x37   :  { %304 = vmatpush3.xpose.msk.msra.mxu0 %vm97_vm13, %v325_v7 }
  0x38   :  { %305 = vmatprep.subr.mxu0 %v323_v1 }
  0x3b   :  { %306 = vmatpush3.xpose.msk.msra.mxu0 %vm96_vm14, %v325_v7 }
  0x3c   :  { %307 = vmatprep.subr.mxu0 %v323_v1 }
  0x3f   :  { %308 = vmatpush3.xpose.msk.msra.mxu0 %vm95_vm15, %v325_v7 }
  0x40   :  { %309 = vmatprep.subr.mxu0 %v323_v1 }
  0x43   :  { %310 = vmatpush3.xpose.msk.msra.mxu0 %vm94_vm0, %v325_v7 }
  0x46   :  { %312 = vmatmul.mubr.f32.vlgmr.msra.gmra.mxu0 %v322_v29 }
 0x106   :  { %v209_v31 = vpop.f32.mrf.mxu0 }
 0x107   :  { %v213_v32 = vadd.f32 %v209_v31, %v142_v30 }
 0x108   :  { %v313_v33 = vpop.f32.mrf.mxu0 }
 0x109   :  { %214 = vst [vmem:[%s436_s3] sm:$0x1] %v213_v32 }

// kernel: disp_layer_forward.4
= control target key start
LH: loop header
LB: loop body
LE: loop exit
PB: predicated region body
PF: predicated region fallthrough
CT: control target
= control target key end

     0   :  { %vm378_vm1 = vcmask 1040384   ;;  %s1256_s2 = inlined_call_operand.vmem [shape: f32[1,128], index: 2, kind: input, shape index: {}]   ;;  %s1257_s4 = inlined_call_operand.vmem [shape: f32[3,25,1,128], index: 4, kind: input, shape index: {}]   ;;  %s1258_s3 = inlined_call_operand.vmem [shape: f32[1,128], index: 3, kind: input, shape index: {}]   ;;  %s1259_s1 = inlined_call_operand.vmem [shape: f32[1,128], index: 1, kind: input, shape index: {}]   ;;  %s1260_s0 = inlined_call_operand.vmem [shape: f32[1,128], index: 0, kind: input, shape index: {}]   ;;  %s1261_s5 = inlined_call_operand.vmem [shape: f32[1,128], index: 5, kind: output, shape index: {}]  }
   0x1   :  { %v21_v0 = vld [vmem:[%s1256_s2] sm:$0x1]  ;;  %v542_v1 = vld [vmem:[%s1257_s4 + $0x19] sm:$0x1]  ;;  %v543_v2 = vld [vmem:[%s1257_s4 + $0x1a] sm:$0x1] }
   0x2   :  { %v544_v3 = vld [vmem:[%s1257_s4 + $0x1b] sm:$0x1]  ;;  %v545_v4 = vld [vmem:[%s1257_s4 + $0x1c] sm:$0x1]  ;;  %v546_v5 = vld [vmem:[%s1257_s4 + $0x1d] sm:$0x1]  ;;  %v100_v6 = vsub.f32 %v542_v1, %v21_v0  ;;  %v101_v7 = vsub.f32 %v543_v2, %v21_v0 }
   0x3   :  { %v547_v8 = vld [vmem:[%s1257_s4 + $0x1e] sm:$0x1]  ;;  %v548_v9 = vld [vmem:[%s1257_s4 + $0x1f] sm:$0x1]  ;;  %v549_v10 = vld [vmem:[%s1257_s4 + $0x20] sm:$0x1]  ;;  %v102_v11 = vsub.f32 %v544_v3, %v21_v0  ;;  %v103_v16 = vsub.f32 %v545_v4, %v21_v0  ;;  %v104_v17 = vsub.f32 %v546_v5, %v21_v0 }
   0x4   :  { %v550_v13 = vld [vmem:[%s1257_s4 + $0x21] sm:$0x1]  ;;  %v551_v14 = vld [vmem:[%s1257_s4 + $0x22] sm:$0x1]  ;;  %v552_v15 = vld [vmem:[%s1257_s4 + $0x23] sm:$0x1]  ;;  %v105_v18 = vsub.f32 %v547_v8, %v21_v0  ;;  %v106_v19 = vsub.f32 %v548_v9, %v21_v0  ;;  %v107_v23 = vsub.f32 %v549_v10, %v21_v0  ;;  %v727_v26 = vmul.f32 %v100_v6, %v100_v6 }
   0x5   :  { %v553_v20 = vld [vmem:[%s1257_s4 + $0x24] sm:$0x1]  ;;  %v554_v21 = vld [vmem:[%s1257_s4 + $0x25] sm:$0x1]  ;;  %v555_v22 = vld [vmem:[%s1257_s4 + $0x26] sm:$0x1]  ;;  %v108_v24 = vsub.f32 %v550_v13, %v21_v0  ;;  %v109_v25 = vsub.f32 %v551_v14, %v21_v0  ;;  %v110_v30 = vsub.f32 %v552_v15, %v21_v0  ;;  %v738_v33 = vmul.f32 %v101_v7, %v101_v7 }
   0x6   :  { %v556_v27 = vld [vmem:[%s1257_s4 + $0x27] sm:$0x1]  ;;  %v557_v28 = vld [vmem:[%s1257_s4 + $0x28] sm:$0x1]  ;;  %v558_v29 = vld [vmem:[%s1257_s4 + $0x29] sm:$0x1]  ;;  %v111_v31 = vsub.f32 %v553_v20, %v21_v0  ;;  %v112_v32 = vsub.f32 %v554_v21, %v21_v0  ;;  %v113_v37 = vsub.f32 %v555_v22, %v21_v0  ;;  %v749_v40 = vmul.f32 %v102_v11, %v102_v11 }
   0x7   :  { %v559_v34 = vld [vmem:[%s1257_s4 + $0x2a] sm:$0x1]  ;;  %v560_v35 = vld [vmem:[%s1257_s4 + $0x2b] sm:$0x1]  ;;  %v561_v36 = vld [vmem:[%s1257_s4 + $0x2c] sm:$0x1]  ;;  %v114_v38 = vsub.f32 %v556_v27, %v21_v0  ;;  %v115_v39 = vsub.f32 %v557_v28, %v21_v0  ;;  %v116_v44 = vsub.f32 %v558_v29, %v21_v0  ;;  %v760_v47 = vmul.f32 %v103_v16, %v103_v16 }
   0x8   :  { %v562_v41 = vld [vmem:[%s1257_s4 + $0x2d] sm:$0x1]  ;;  %v563_v42 = vld [vmem:[%s1257_s4 + $0x2e] sm:$0x1]  ;;  %v564_v43 = vld [vmem:[%s1257_s4 + $0x2f] sm:$0x1]  ;;  %v117_v45 = vsub.f32 %v559_v34, %v21_v0  ;;  %v118_v46 = vsub.f32 %v560_v35, %v21_v0  ;;  %v119_v50 = vsub.f32 %v561_v36, %v21_v0  ;;  %v768_v53 = vmul.f32 %v104_v17, %v104_v17 }
   0x9   :  { %v565_v48 = vld [vmem:[%s1257_s4 + $0x30] sm:$0x1]  ;;  %v566_v49 = vld [vmem:[%s1257_s4 + $0x31] sm:$0x1]  ;;  %v120_v51 = vsub.f32 %v562_v41, %v21_v0  ;;  %v121_v52 = vsub.f32 %v563_v42, %v21_v0  ;;  %v773_v54 = vld [vmem:[%s1258_s3] sm:$0x1]  ;;  %v122_v56 = vsub.f32 %v564_v43, %v21_v0  ;;  %v778_v59 = vmul.f32 %v105_v18, %v105_v18 }
   0xa   :  { %v567_v55 = vld [vmem:[%s1257_s4 + $0x32] sm:$0x1]  ;;  %v123_v57 = vsub.f32 %v565_v48, %v21_v0  ;;  %v124_v58 = vsub.f32 %v566_v49, %v21_v0  ;;  %v568_v60 = vld [vmem:[%s1257_s4 + $0x33] sm:$0x1]  ;;  %v569_v61 = vld [vmem:[%s1257_s4 + $0x34] sm:$0x1]  ;;  %v789_v63 = vmul.f32 %v106_v19, %v106_v19  ;;  %v791_v1 = vmul.f32 %v107_v23, %v107_v23 }
   0xb   :  { %v570_v62 = vld [vmem:[%s1257_s4 + $0x35] sm:$0x1]  ;;  %v793_v2 = vmul.f32 %v108_v24, %v108_v24  ;;  %v795_v0 = vmul.f32 %v109_v25, %v109_v25  ;;  %v571_v3 = vld [vmem:[%s1257_s4 + $0x36] sm:$0x1]  ;;  %v572_v4 = vld [vmem:[%s1257_s4 + $0x37] sm:$0x1]  ;;  %v806_v6 = vmul.f32 %v110_v30, %v110_v30  ;;  %v808_v7 = vmul.f32 %v111_v31, %v111_v31 }
   0xc   :  { %v573_v5 = vld [vmem:[%s1257_s4 + $0x38] sm:$0x1]  ;;  %v810_v8 = vmul.f32 %v112_v32, %v112_v32  ;;  %v812_v9 = vmul.f32 %v113_v37, %v113_v37  ;;  %v574_v10 = vld [vmem:[%s1257_s4 + $0x39] sm:$0x1]  ;;  %v575_v11 = vld [vmem:[%s1257_s4 + $0x3a] sm:$0x1]  ;;  %v823_v14 = vmul.f32 %v114_v38, %v114_v38  ;;  %v825_v15 = vmul.f32 %v115_v39, %v115_v39 }
   0xd   :  { %v576_v13 = vld [vmem:[%s1257_s4 + $0x3b] sm:$0x1]  ;;  %v827_v16 = vmul.f32 %v116_v44, %v116_v44  ;;  %v829_v17 = vmul.f32 %v117_v45, %v117_v45  ;;  %v577_v18 = vld [vmem:[%s1257_s4 + $0x3c] sm:$0x1]  ;;  %v578_v19 = vld [vmem:[%s1257_s4 + $0x3d] sm:$0x1]  ;;  %v840_v21 = vmul.f32 %v118_v46, %v118_v46  ;;  %v842_v22 = vmul.f32 %v119_v50, %v119_v50 }
   0xe   :  { %v579_v20 = vld [vmem:[%s1257_s4 + $0x3e] sm:$0x1]  ;;  %v844_v23 = vmul.f32 %v120_v51, %v120_v51  ;;  %v846_v24 = vmul.f32 %v121_v52, %v121_v52  ;;  %v580_v25 = vld [vmem:[%s1257_s4 + $0x3f] sm:$0x1]  ;;  %v581_v27 = vld [vmem:[%s1257_s4 + $0x40] sm:$0x1]  ;;  %v857_v29 = vmul.f32 %v122_v56, %v122_v56  ;;  %v859_v30 = vmul.f32 %v123_v57, %v123_v57 }
   0xf   :  { %1262 = vst [vmem:[#allocation2_spill] sm:$0xff] %v840_v21  ;;  %1263 = vst [vmem:[#allocation3_spill] sm:$0xff] %v842_v22  ;;  %v582_v28 = vld [vmem:[%s1257_s4 + $0x41] sm:$0x1]  ;;  %v861_v31 = vmul.f32 %v124_v58, %v124_v58  ;;  %v150_v32 = vsub.f32 %v567_v55, %v773_v54  ;;  %v583_v34 = vld [vmem:[%s1257_s4 + $0x42] sm:$0x1]  ;;  %v151_v37 = vsub.f32 %v568_v60, %v773_v54 }
  0x10   :  { %1264 = vst [vmem:[#allocation4_spill] sm:$0xff] %v844_v23  ;;  %1265 = vst [vmem:[#allocation5_spill] sm:$0xff] %v846_v24  ;;  %v584_v35 = vld [vmem:[%s1257_s4 + $0x43] sm:$0x1]  ;;  %v585_v36 = vld [vmem:[%s1257_s4 + $0x44] sm:$0x1]  ;;  %v152_v38 = vsub.f32 %v569_v61, %v773_v54  ;;  %v153_v39 = vsub.f32 %v570_v62, %v773_v54  ;;  %v154_v41 = vsub.f32 %v571_v3, %v773_v54 }
  0x11   :  { %1266 = vst [vmem:[#allocation6_spill] sm:$0xff] %v857_v29  ;;  %1267 = vst [vmem:[#allocation7_spill] sm:$0xff] %v859_v30  ;;  %v586_v42 = vld [vmem:[%s1257_s4 + $0x45] sm:$0x1]  ;;  %v587_v43 = vld [vmem:[%s1257_s4 + $0x46] sm:$0x1]  ;;  %v155_v45 = vsub.f32 %v572_v4, %v773_v54  ;;  %v156_v46 = vsub.f32 %v573_v5, %v773_v54  ;;  %v157_v48 = vsub.f32 %v574_v10, %v773_v54 }
  0x12   :  { %1268 = vst [vmem:[#allocation8_spill] sm:$0xff] %v861_v31  ;;  %v588_v44 = vld [vmem:[%s1257_s4 + $0x47] sm:$0x1]  ;;  %v158_v49 = vsub.f32 %v575_v11, %v773_v54  ;;  %v589_v50 = vld [vmem:[%s1257_s4 + $0x48] sm:$0x1]  ;;  %v159_v55 = vsub.f32 %v576_v13, %v773_v54  ;;  %v160_v56 = vsub.f32 %v577_v18, %v773_v54  ;;  %v161_v57 = vsub.f32 %v578_v19, %v773_v54 }
  0x13   :  { %v590_v51 = vld [vmem:[%s1257_s4 + $0x49] sm:$0x1]  ;;  %v591_v52 = vld [vmem:[%s1257_s4 + $0x4a] sm:$0x1]  ;;  %v162_v58 = vsub.f32 %v579_v20, %v773_v54  ;;  %v163_v60 = vsub.f32 %v580_v25, %v773_v54  ;;  %v164_v61 = vsub.f32 %v581_v27, %v773_v54  ;;  %v165_v62 = vsub.f32 %v582_v28, %v773_v54 }
  0x14   :  { %v166_v3 = vsub.f32 %v583_v34, %v773_v54  ;;  %v167_v4 = vsub.f32 %v584_v35, %v773_v54  ;;  %v168_v5 = vsub.f32 %v585_v36, %v773_v54  ;;  %v169_v10 = vsub.f32 %v586_v42, %v773_v54 }
  0x15   :  { %v170_v11 = vsub.f32 %v587_v43, %v773_v54  ;;  %v171_v13 = vsub.f32 %v588_v44, %v773_v54  ;;  %v172_v18 = vsub.f32 %v589_v50, %v773_v54  ;;  %v173_v19 = vsub.f32 %v590_v51, %v773_v54 }
  0x16   :  { %v174_v20 = vsub.f32 %v591_v52, %v773_v54  ;;  %v175_v25 = vmul.f32 %v150_v32, %v150_v32  ;;  %v176_v27 = vmul.f32 %v151_v37, %v151_v37  ;;  %v177_v28 = vmul.f32 %v152_v38, %v152_v38 }
  0x17   :  { %v178_v34 = vmul.f32 %v153_v39, %v153_v39  ;;  %v179_v12 = vmul.f32 %v154_v41, %v154_v41  ;;  %v180_v35 = vmul.f32 %v155_v45, %v155_v45  ;;  %v181_v31 = vmul.f32 %v156_v46, %v156_v46 }
  0x18   :  { %v182_v36 = vmul.f32 %v157_v48, %v157_v48  ;;  %v183_v30 = vmul.f32 %v158_v49, %v158_v49  ;;  %v184_v42 = vmul.f32 %v159_v55, %v159_v55  ;;  %v185_v29 = vmul.f32 %v160_v56, %v160_v56 }
  0x19   :  { %v186_v43 = vmul.f32 %v161_v57, %v161_v57  ;;  %v187_v24 = vmul.f32 %v162_v58, %v162_v58  ;;  %v188_v44 = vmul.f32 %v163_v60, %v163_v60  ;;  %v189_v23 = vmul.f32 %v164_v61, %v164_v61  ;;  %v1273_v61 = vld [vmem:[#allocation6_spill] sm:$0xff] }
  0x1a   :  { %v190_v50 = vmul.f32 %v165_v62, %v165_v62  ;;  %v191_v22 = vmul.f32 %v166_v3, %v166_v3  ;;  %v192_v51 = vmul.f32 %v167_v4, %v167_v4  ;;  %v193_v21 = vmul.f32 %v168_v5, %v168_v5  ;;  %v1275_v62 = vld [vmem:[#allocation8_spill] sm:$0xff] }
  0x1b   :  { %v194_v54 = vmul.f32 %v169_v10, %v169_v10  ;;  %v195_v32 = vmul.f32 %v170_v11, %v170_v11  ;;  %v196_v37 = vmul.f32 %v171_v13, %v171_v13  ;;  %v197_v38 = vmul.f32 %v172_v18, %v172_v18 }
  0x1c   :  { %v198_v39 = vmul.f32 %v173_v19, %v173_v19  ;;  %v199_v41 = vmul.f32 %v174_v20, %v174_v20  ;;  %v200_v45 = vadd.f32 %v175_v25, %v727_v26  ;;  %v201_v46 = vadd.f32 %v176_v27, %v738_v33 }
  0x1d   :  { %v202_v48 = vadd.f32 %v177_v28, %v749_v40  ;;  %v203_v49 = vadd.f32 %v178_v34, %v760_v47  ;;  %v204_v52 = vadd.f32 %v179_v12, %v768_v53  ;;  %v205_v55 = vadd.f32 %v180_v35, %v778_v59 }
  0x1e   :  { %v206_v56 = vadd.f32 %v181_v31, %v789_v63  ;;  %v207_v57 = vadd.f32 %v182_v36, %v791_v1  ;;  %v208_v58 = vadd.f32 %v183_v30, %v793_v2  ;;  %v209_v60 = vadd.f32 %v184_v42, %v795_v0  ;;  %v1269_v1 = vld [vmem:[#allocation2_spill] sm:$0xff]  ;;  %v1270_v30 = vld [vmem:[#allocation3_spill] sm:$0xff]  ;;  %v1271_v31 = vld [vmem:[#allocation4_spill] sm:$0xff] }
  0x1f   :  { %v210_v26 = vadd.f32 %v185_v29, %v806_v6  ;;  %v211_v33 = vadd.f32 %v186_v43, %v808_v7  ;;  %v212_v40 = vadd.f32 %v187_v24, %v810_v8  ;;  %v213_v47 = vadd.f32 %v188_v44, %v812_v9  ;;  %v1272_v29 = vld [vmem:[#allocation5_spill] sm:$0xff]  ;;  %v1274_v24 = vld [vmem:[#allocation7_spill] sm:$0xff] }
  0x20   :  { %v214_v12 = vadd.f32 %v189_v23, %v823_v14  ;;  %v215_v53 = vadd.f32 %v190_v50, %v825_v15  ;;  %v216_v59 = vadd.f32 %v191_v22, %v827_v16  ;;  %v217_v63 = vadd.f32 %v192_v51, %v829_v17 }
  0x21   :  { %v218_v2 = vadd.f32 %v193_v21, %v1269_v1  ;;  %v219_v0 = vadd.f32 %v194_v54, %v1270_v30  ;;  %v220_v6 = vadd.f32 %v195_v32, %v1271_v31  ;;  %v221_v7 = vadd.f32 %v196_v37, %v1272_v29 }
  0x22   :  { %v222_v8 = vadd.f32 %v197_v38, %v1273_v61  ;;  %v223_v9 = vadd.f32 %v198_v39, %v1274_v24  ;;  %v224_v14 = vadd.f32 %v199_v41, %v1275_v62  ;;  %v940_v23 = vmul.f32 -4.0, %v200_v45 }
  0x23   :  { %v942_v15 = vmul.f32 -4.0, %v201_v46  ;;  %v944_v16 = vmul.f32 -4.0, %v202_v48  ;;  %v946_v17 = vmul.f32 -4.0, %v203_v49  ;;  %v948_v21 = vmul.f32 -4.0, %v204_v52 }
  0x24   :  { %v950_v22 = vmul.f32 -4.0, %v205_v55  ;;  %v952_v3 = vmul.f32 -4.0, %v206_v56  ;;  %v954_v4 = vmul.f32 -4.0, %v207_v57  ;;  %v956_v5 = vmul.f32 -4.0, %v208_v58 }
  0x25   :  { %v958_v10 = vmul.f32 -4.0, %v209_v60  ;;  %v960_v11 = vmul.f32 -4.0, %v210_v26  ;;  %v962_v13 = vmul.f32 -4.0, %v211_v33  ;;  %v964_v18 = vmul.f32 -4.0, %v212_v40 }
  0x26   :  { %v966_v19 = vmul.f32 -4.0, %v213_v47  ;;  %v968_v20 = vmul.f32 -4.0, %v214_v12  ;;  %v970_v25 = vmul.f32 -4.0, %v215_v53  ;;  %v972_v27 = vmul.f32 -4.0, %v216_v59 }
  0x27   :  { %v974_v28 = vmul.f32 -4.0, %v217_v63  ;;  %v976_v34 = vmul.f32 -4.0, %v218_v2  ;;  %v978_v35 = vmul.f32 -4.0, %v219_v0  ;;  %v980_v36 = vmul.f32 -4.0, %v220_v6 }
  0x28   :  { %v982_v42 = vmul.f32 -4.0, %v221_v7  ;;  %v984_v43 = vmul.f32 -4.0, %v222_v8  ;;  %v986_v44 = vmul.f32 -4.0, %v223_v9  ;;  %v988_v50 = vmul.f32 -4.0, %v224_v14 }
  0x29   :  { %v1276_v51 = vlaneseq }
  0x2b   :  { %vm991_vm0 = vcmp.lt.s32.totalorder %v1276_v51, 128 }
  0x2c   :  { %v254_v32 = vsel %vm991_vm0, %v940_v23, -inf  ;;  %v255_v37 = vsel %vm991_vm0, %v942_v15, -inf  ;;  %v256_v38 = vsel %vm991_vm0, %v944_v16, -inf  ;;  %v257_v39 = vsel %vm991_vm0, %v946_v17, -inf }
  0x2d   :  { %v258_v41 = vsel %vm991_vm0, %v948_v21, -inf  ;;  %v260_v45 = vsel %vm991_vm0, %v950_v22, -inf  ;;  %v262_v46 = vsel %vm991_vm0, %v952_v3, -inf  ;;  %v264_v48 = vsel %vm991_vm0, %v954_v4, -inf }
  0x2e   :  { %v259_v49 = vmax.f32 %v254_v32, %v258_v41  ;;  %v261_v52 = vmax.f32 %v255_v37, %v260_v45  ;;  %v263_v55 = vmax.f32 %v256_v38, %v262_v46  ;;  %v265_v56 = vmax.f32 %v257_v39, %v264_v48 }
  0x2f   :  { %v266_v57 = vsel %vm991_vm0, %v956_v5, -inf  ;;  %v268_v58 = vsel %vm991_vm0, %v958_v10, -inf  ;;  %v270_v60 = vsel %vm991_vm0, %v960_v11, -inf  ;;  %v272_v26 = vsel %vm991_vm0, %v962_v13, -inf }
  0x30   :  { %v267_v33 = vmax.f32 %v259_v49, %v266_v57  ;;  %v269_v40 = vmax.f32 %v261_v52, %v268_v58  ;;  %v271_v47 = vmax.f32 %v263_v55, %v270_v60  ;;  %v273_v12 = vmax.f32 %v265_v56, %v272_v26 }
  0x31   :  { %v274_v53 = vsel %vm991_vm0, %v964_v18, -inf  ;;  %v276_v59 = vsel %vm991_vm0, %v966_v19, -inf  ;;  %v278_v63 = vsel %vm991_vm0, %v968_v20, -inf  ;;  %v280_v1 = vsel %vm991_vm0, %v970_v25, -inf }
  0x32   :  { %v275_v2 = vmax.f32 %v267_v33, %v274_v53  ;;  %v277_v30 = vmax.f32 %v269_v40, %v276_v59  ;;  %v279_v0 = vmax.f32 %v271_v47, %v278_v63  ;;  %v281_v31 = vmax.f32 %v273_v12, %v280_v1 }
  0x33   :  { %v282_v6 = vsel %vm991_vm0, %v972_v27, -inf  ;;  %v284_v29 = vsel %vm991_vm0, %v974_v28, -inf  ;;  %v286_v7 = vsel %vm991_vm0, %v976_v34, -inf  ;;  %v288_v61 = vsel %vm991_vm0, %v978_v35, -inf }
  0x34   :  { %v283_v8 = vmax.f32 %v275_v2, %v282_v6  ;;  %v285_v24 = vmax.f32 %v277_v30, %v284_v29  ;;  %v287_v9 = vmax.f32 %v279_v0, %v286_v7  ;;  %v289_v62 = vmax.f32 %v281_v31, %v288_v61 }
  0x35   :  { %v290_v14 = vsel %vm991_vm0, %v980_v36, -inf  ;;  %v292_v51 = vsel %vm991_vm0, %v982_v42, -inf  ;;  %v294_v32 = vsel %vm991_vm0, %v984_v43, -inf  ;;  %v296_v37 = vsel %vm991_vm0, %v986_v44, -inf }
  0x36   :  { %v291_v38 = vmax.f32 %v283_v8, %v290_v14  ;;  %v293_v39 = vmax.f32 %v285_v24, %v292_v51  ;;  %v295_v41 = vmax.f32 %v287_v9, %v294_v32  ;;  %v297_v45 = vmax.f32 %v289_v62, %v296_v37 }
  0x37   :  { %v298_v46 = vsel %vm991_vm0, %v988_v50, -inf }
  0x38   :  { %v299_v48 = vmax.f32 %v291_v38, %v298_v46  ;;  %v301_v49 = vmax.f32 %v295_v41, %v297_v45 }
  0x3a   :  { %v300_v52 = vmax.f32 %v299_v48, %v293_v39  ;;  %v26_v39 = vld [vmem:[%s1257_s4 + $0x3] sm:$0x1]  ;;  %v27_v48 = vld [vmem:[%s1257_s4 + $0x4] sm:$0x1] }
  0x3c   :  { %v1070_v55 = vmax.f32 %v300_v52, %v301_v49 }
  0x3e   :  { %v303_v56 = vsub.f32 %v940_v23, %v1070_v55  ;;  %v304_v57 = vsub.f32 %v942_v15, %v1070_v55  ;;  %v305_v58 = vsub.f32 %v944_v16, %v1070_v55  ;;  %v306_v60 = vsub.f32 %v946_v17, %v1070_v55 }
  0x3f   :  { %v307_v54 = vsub.f32 %v948_v21, %v1070_v55  ;;  %v308_v26 = vsub.f32 %v950_v22, %v1070_v55  ;;  %v309_v23 = vsub.f32 %v952_v3, %v1070_v55  ;;  %v310_v16 = vsub.f32 %v954_v4, %v1070_v55 }
  0x40   :  { %v328_v33 = vmul.f32 1.442695, %v303_v56  ;;  %v330_v40 = vmul.f32 1.442695, %v304_v57  ;;  %v332_v47 = vmul.f32 1.442695, %v305_v58  ;;  %v311_v21 = vsub.f32 %v956_v5, %v1070_v55 }
  0x41   :  { %v334_v12 = vmul.f32 1.442695, %v306_v60  ;;  %v336_v15 = vmul.f32 1.442695, %v307_v54  ;;  %v338_v17 = vmul.f32 1.442695, %v308_v26  ;;  %v312_v53 = vsub.f32 %v958_v10, %v1070_v55 }
  0x42   :  { %592 = vpow2.f32 %v328_v33  ;;  %v340_v22 = vmul.f32 1.442695, %v309_v23  ;;  %v342_v3 = vmul.f32 1.442695, %v310_v16  ;;  %v313_v59 = vsub.f32 %v960_v11, %v1070_v55  ;;  %v23_v5 = vld [vmem:[%s1257_s4] sm:$0x1] }
  0x43   :  { %594 = vpow2.f32 %v330_v40  ;;  %v344_v63 = vmul.f32 1.442695, %v311_v21  ;;  %v314_v4 = vsub.f32 %v962_v13, %v1070_v55  ;;  %v346_v1 = vmul.f32 1.442695, %v312_v53  ;;  %v24_v11 = vld [vmem:[%s1257_s4 + $0x1] sm:$0x1] }
  0x44   :  { %596 = vpow2.f32 %v332_v47  ;;  %v315_v2 = vsub.f32 %v964_v18, %v1070_v55  ;;  %v348_v10 = vmul.f32 1.442695, %v313_v59  ;;  %v316_v13 = vsub.f32 %v966_v19, %v1070_v55  ;;  %v25_v19 = vld [vmem:[%s1257_s4 + $0x2] sm:$0x1]  ;;  %v28_v54 = vld [vmem:[%s1257_s4 + $0x5] sm:$0x1] }
  0x45   :  { %598 = vpow2.f32 %v334_v12  ;;  %v350_v0 = vmul.f32 1.442695, %v314_v4  ;;  %v317_v6 = vsub.f32 %v968_v20, %v1070_v55  ;;  %v318_v62 = vsub.f32 %v970_v25, %v1070_v55 }
  0x46   :  { %600 = vpow2.f32 %v336_v15  ;;  %v352_v61 = vmul.f32 1.442695, %v315_v2  ;;  %v354_v32 = vmul.f32 1.442695, %v316_v13  ;;  %v319_v41 = vsub.f32 %v972_v27, %v1070_v55  ;;  %v31_v13 = vld [vmem:[%s1257_s4 + $0x8] sm:$0x1] }
  0x47   :  { %602 = vpow2.f32 %v338_v17  ;;  %v356_v45 = vmul.f32 1.442695, %v317_v6  ;;  %v320_v58 = vsub.f32 %v974_v28, %v1070_v55  ;;  %v358_v60 = vmul.f32 1.442695, %v318_v62  ;;  %v29_v28 = vld [vmem:[%s1257_s4 + $0x6] sm:$0x1] }
  0x48   :  { %604 = vpow2.f32 %v340_v22  ;;  %v321_v23 = vsub.f32 %v976_v34, %v1070_v55  ;;  %v360_v16 = vmul.f32 1.442695, %v319_v41  ;;  %v322_v53 = vsub.f32 %v978_v35, %v1070_v55  ;;  %v30_v34 = vld [vmem:[%s1257_s4 + $0x7] sm:$0x1] }
  0x49   :  { %606 = vpow2.f32 %v342_v3  ;;  %v362_v3 = vmul.f32 1.442695, %v320_v58  ;;  %v327_v58 = vsub.f32 %v988_v50, %v1070_v55  ;;  %v36_v50 = vld [vmem:[%s1257_s4 + $0xd] sm:$0x1] }
  0x4a   :  { %608 = vpow2.f32 %v344_v63 }
  0x4b   :  { %610 = vpow2.f32 %v346_v1 }
  0x4c   :  { %612 = vpow2.f32 %v348_v10  ;;  %v323_v10 = vsub.f32 %v980_v36, %v1070_v55 }
  0x4d   :  { %614 = vpow2.f32 %v350_v0  ;;  %v364_v0 = vmul.f32 1.442695, %v321_v23 }
  0x4e   :  { %616 = vpow2.f32 %v352_v61 }
  0x4f   :  { %v593_v30 = vpop.eup %592  ;;  %618 = vpow2.f32 %v354_v32  ;;  %v33_v32 = vld [vmem:[%s1257_s4 + $0xa] sm:$0x1] }
  0x50   :  { %v595_v31 = vpop.eup %594  ;;  %v379_v29 = vsel %vm378_vm1, %v593_v30, 0.0  ;;  %v428_v18 = vmul.f32 %v593_v30, %v23_v5  ;;  %620 = vpow2.f32 %v356_v45  ;;  %v326_v45 = vsub.f32 %v986_v44, %v1070_v55 }
  0x51   :  { %v597_v7 = vpop.eup %596  ;;  %v380_v8 = vsel %vm378_vm1, %v595_v31, 0.0  ;;  %v429_v24 = vmul.f32 %v595_v31, %v24_v11  ;;  %622 = vpow2.f32 %v358_v60 }
  0x52   :  { %v599_v9 = vpop.eup %598  ;;  %v381_v14 = vadd.f32 %v380_v8, %v379_v29  ;;  %v382_v20 = vsel %vm378_vm1, %v597_v7, 0.0  ;;  %v453_v25 = vsel %vm378_vm1, %v428_v18, 0.0  ;;  %v430_v52 = vmul.f32 %v597_v7, %v25_v19  ;;  %v32_v8 = vld [vmem:[%s1257_s4 + $0x9] sm:$0x1] }
  0x53   :  { %v601_v51 = vpop.eup %600  ;;  %v384_v37 = vsel %vm378_vm1, %v599_v9, 0.0  ;;  %v454_v56 = vsel %vm378_vm1, %v429_v24, 0.0  ;;  %v431_v33 = vmul.f32 %v599_v9, %v26_v39  ;;  %624 = vpow2.f32 %v360_v16 }
  0x54   :  { %v603_v38 = vpop.eup %602  ;;  %v383_v46 = vadd.f32 %v382_v20, %v381_v14  ;;  %v386_v49 = vsel %vm378_vm1, %v601_v51, 0.0  ;;  %v455_v40 = vadd.f32 %v454_v56, %v453_v25  ;;  %v432_v15 = vmul.f32 %v601_v51, %v27_v48  ;;  %v34_v48 = vld [vmem:[%s1257_s4 + $0xb] sm:$0x1] }
  0x55   :  { %v605_v57 = vpop.eup %604  ;;  %v388_v26 = vsel %vm378_vm1, %v603_v38, 0.0  ;;  %v456_v21 = vsel %vm378_vm1, %v430_v52, 0.0  ;;  %v433_v63 = vmul.f32 %v603_v38, %v28_v54  ;;  %v458_v5 = vsel %vm378_vm1, %v431_v33, 0.0  ;;  %v35_v54 = vld [vmem:[%s1257_s4 + $0xc] sm:$0x1] }
  0x56   :  { %v385_v27 = vadd.f32 %v384_v37, %v383_v46  ;;  %v607_v47 = vpop.eup %606  ;;  %v390_v17 = vsel %vm378_vm1, %v605_v57, 0.0  ;;  %v457_v1 = vadd.f32 %v456_v21, %v455_v40  ;;  %v434_v30 = vmul.f32 %v605_v57, %v29_v28 }
  0x57   :  { %v609_v22 = vpop.eup %608  ;;  %v392_v4 = vsel %vm378_vm1, %v607_v47, 0.0  ;;  %v460_v35 = vsel %vm378_vm1, %v432_v15, 0.0  ;;  %v324_v18 = vsub.f32 %v982_v42, %v1070_v55  ;;  %v435_v61 = vmul.f32 %v607_v47, %v30_v34 }
  0x58   :  { %v387_v12 = vadd.f32 %v386_v49, %v385_v27  ;;  %v611_v2 = vpop.eup %610  ;;  %v394_v31 = vsel %vm378_vm1, %v609_v22, 0.0  ;;  %v459_v6 = vadd.f32 %v458_v5, %v457_v1  ;;  %v462_v36 = vsel %vm378_vm1, %v433_v63, 0.0 }
  0x59   :  { %v613_v29 = vpop.eup %612  ;;  %626 = vpow2.f32 %v362_v3  ;;  %v366_v24 = vmul.f32 1.442695, %v322_v53  ;;  %v396_v9 = vsel %vm378_vm1, %v611_v2, 0.0  ;;  %v325_v14 = vsub.f32 %v984_v43, %v1070_v55  ;;  %v37_v3 = vld [vmem:[%s1257_s4 + $0xe] sm:$0x1] }
  0x5a   :  { %v389_v59 = vadd.f32 %v388_v26, %v387_v12  ;;  %v461_v19 = vadd.f32 %v460_v35, %v459_v6  ;;  %v615_v62 = vpop.eup %614  ;;  %v436_v51 = vmul.f32 %v609_v22, %v31_v13  ;;  %v464_v42 = vsel %vm378_vm1, %v434_v30, 0.0  ;;  %v39_v6 = vld [vmem:[%s1257_s4 + $0x10] sm:$0x1] }
  0x5b   :  { %628 = vpow2.f32 %v364_v0  ;;  %v368_v37 = vmul.f32 1.442695, %v323_v10  ;;  %v398_v38 = vsel %vm378_vm1, %v613_v29, 0.0  ;;  %v617_v41 = vpop.eup %616  ;;  %v437_v25 = vmul.f32 %v611_v2, %v32_v8  ;;  %v38_v10 = vld [vmem:[%s1257_s4 + $0xf] sm:$0x1] }
  0x5c   :  { %v391_v11 = vadd.f32 %v390_v17, %v389_v59  ;;  %v463_v39 = vadd.f32 %v462_v36, %v461_v19  ;;  %v466_v43 = vsel %vm378_vm1, %v435_v61, 0.0  ;;  %630 = vpow2.f32 %v366_v24  ;;  %v619_v57 = vpop.eup %618  ;;  %v40_v24 = vld [vmem:[%s1257_s4 + $0x11] sm:$0x1] }
  0x5d   :  { %v370_v49 = vmul.f32 1.442695, %v324_v18  ;;  %v400_v52 = vsel %vm378_vm1, %v615_v62, 0.0  ;;  %v438_v27 = vmul.f32 %v613_v29, %v33_v32  ;;  %v468_v44 = vsel %vm378_vm1, %v436_v51, 0.0  ;;  %v621_v47 = vpop.eup %620 }
  0x5e   :  { %v393_v7 = vadd.f32 %v392_v4, %v391_v11  ;;  %v465_v56 = vadd.f32 %v464_v42, %v463_v39  ;;  %632 = vpow2.f32 %v368_v37  ;;  %v372_v26 = vmul.f32 1.442695, %v325_v14  ;;  %v623_v17 = vpop.eup %622  ;;  %v41_v42 = vld [vmem:[%s1257_s4 + $0x12] sm:$0x1] }
  0x5f   :  { %v402_v33 = vsel %vm378_vm1, %v617_v41, 0.0  ;;  %v439_v12 = vmul.f32 %v615_v62, %v34_v48  ;;  %v470_v15 = vsel %vm378_vm1, %v437_v25, 0.0  ;;  %634 = vpow2.f32 %v370_v49 }
  0x60   :  { %v395_v20 = vadd.f32 %v394_v31, %v393_v7  ;;  %v467_v40 = vadd.f32 %v466_v43, %v465_v56  ;;  %v374_v55 = vmul.f32 1.442695, %v326_v45  ;;  %v404_v28 = vsel %vm378_vm1, %v619_v57, 0.0  ;;  %v625_v4 = vpop.eup %624 }
  0x61   :  { %v440_v22 = vmul.f32 %v617_v41, %v35_v54  ;;  %v472_v53 = vsel %vm378_vm1, %v438_v27, 0.0  ;;  %636 = vpow2.f32 %v372_v26  ;;  %v376_v59 = vmul.f32 1.442695, %v327_v58 }
  0x62   :  { %v397_v46 = vadd.f32 %v396_v9, %v395_v20  ;;  %v469_v16 = vadd.f32 %v468_v44, %v467_v40  ;;  %v406_v63 = vsel %vm378_vm1, %v621_v47, 0.0  ;;  %v441_v5 = vmul.f32 %v619_v57, %v36_v50  ;;  %v43_v57 = vld [vmem:[%s1257_s4 + $0x14] sm:$0x1] }
  0x63   :  { %v474_v2 = vsel %vm378_vm1, %v439_v12, 0.0  ;;  %638 = vpow2.f32 %v374_v55  ;;  %v408_v11 = vsel %vm378_vm1, %v623_v17, 0.0  ;;  %v442_v0 = vmul.f32 %v621_v47, %v37_v3 }
  0x64   :  { %v399_v60 = vadd.f32 %v398_v38, %v397_v46  ;;  %v471_v34 = vadd.f32 %v470_v15, %v469_v16  ;;  %v476_v31 = vsel %vm378_vm1, %v440_v22, 0.0  ;;  %640 = vpow2.f32 %v376_v59  ;;  %v42_v46 = vld [vmem:[%s1257_s4 + $0x13] sm:$0x1] }
  0x65   :  { %v410_v29 = vsel %vm378_vm1, %v625_v4, 0.0  ;;  %v443_v36 = vmul.f32 %v623_v17, %v38_v10  ;;  %v478_v8 = vsel %vm378_vm1, %v441_v5, 0.0  ;;  %v444_v20 = vmul.f32 %v625_v4, %v39_v6  ;;  %v45_v17 = vld [vmem:[%s1257_s4 + $0x16] sm:$0x1]  ;;  %v47_v6 = vld [vmem:[%s1257_s4 + $0x18] sm:$0x1] }
  0x66   :  { %v401_v23 = vadd.f32 %v400_v52, %v399_v60  ;;  %v473_v30 = vadd.f32 %v472_v53, %v471_v34  ;;  %v627_v35 = vpop.eup %626  ;;  %v480_v51 = vsel %vm378_vm1, %v442_v0, 0.0 }
  0x67   :  { %v412_v9 = vsel %vm378_vm1, %v627_v35, 0.0  ;;  %v445_v41 = vmul.f32 %v627_v35, %v40_v24  ;;  %v482_v45 = vsel %vm378_vm1, %v443_v36, 0.0  ;;  %v484_v56 = vsel %vm378_vm1, %v444_v20, 0.0 }
  0x68   :  { %v403_v21 = vadd.f32 %v402_v33, %v401_v23  ;;  %v475_v18 = vadd.f32 %v474_v2, %v473_v30  ;;  %v629_v7 = vpop.eup %628  ;;  %v44_v33 = vld [vmem:[%s1257_s4 + $0x15] sm:$0x1]  ;;  %v46_v2 = vld [vmem:[%s1257_s4 + $0x17] sm:$0x1] }
  0x69   :  { %v631_v62 = vpop.eup %630  ;;  %v414_v32 = vsel %vm378_vm1, %v629_v7, 0.0  ;;  %v446_v52 = vmul.f32 %v629_v7, %v41_v42  ;;  %v486_v26 = vsel %vm378_vm1, %v445_v41, 0.0 }
  0x6a   :  { %v405_v1 = vadd.f32 %v404_v28, %v403_v21  ;;  %v477_v19 = vadd.f32 %v476_v31, %v475_v18  ;;  %v416_v25 = vsel %vm378_vm1, %v631_v62, 0.0  ;;  %v447_v54 = vmul.f32 %v631_v62, %v42_v46 }
  0x6b   :  { %v633_v38 = vpop.eup %632  ;;  %v488_v50 = vsel %vm378_vm1, %v446_v52, 0.0 }
  0x6c   :  { %v407_v13 = vadd.f32 %v406_v63, %v405_v1  ;;  %v479_v37 = vadd.f32 %v478_v8, %v477_v19  ;;  %v635_v48 = vpop.eup %634  ;;  %v418_v58 = vsel %vm378_vm1, %v633_v38, 0.0  ;;  %v448_v15 = vmul.f32 %v633_v38, %v43_v57 }
  0x6d   :  { %v420_v40 = vsel %vm378_vm1, %v635_v48, 0.0  ;;  %v449_v22 = vmul.f32 %v635_v48, %v44_v33  ;;  %v490_v53 = vsel %vm378_vm1, %v447_v54, 0.0 }
  0x6e   :  { %v409_v61 = vadd.f32 %v408_v11, %v407_v13  ;;  %v481_v43 = vadd.f32 %v480_v51, %v479_v37  ;;  %v637_v27 = vpop.eup %636  ;;  %v492_v34 = vsel %vm378_vm1, %v448_v15, 0.0  ;;  %v20_v37 = vld [vmem:[%s1260_s0] sm:$0x1] }
  0x6f   :  { %v422_v55 = vsel %vm378_vm1, %v637_v27, 0.0  ;;  %v450_v1 = vmul.f32 %v637_v27, %v45_v17  ;;  %v494_v11 = vsel %vm378_vm1, %v449_v22, 0.0  ;;  %v507_v41 = vmul.f32 %v20_v37, %v20_v37 }
  0x70   :  { %v411_v14 = vadd.f32 %v410_v29, %v409_v61  ;;  %v483_v60 = vadd.f32 %v482_v45, %v481_v43  ;;  %v639_v23 = vpop.eup %638 }
  0x71   :  { %v641_v16 = vpop.eup %640  ;;  %v424_v3 = vsel %vm378_vm1, %v639_v23, 0.0  ;;  %v451_v13 = vmul.f32 %v639_v23, %v46_v2  ;;  %v496_v31 = vsel %vm378_vm1, %v450_v1, 0.0  ;;  %v508_v43 = vmul.f32 %v507_v41, %v507_v41 }
  0x72   :  { %v413_v39 = vadd.f32 %v412_v9, %v411_v14  ;;  %v485_v47 = vadd.f32 %v484_v56, %v483_v60  ;;  %v426_v4 = vsel %vm378_vm1, %v641_v16, 0.0  ;;  %v452_v18 = vmul.f32 %v641_v16, %v47_v6  ;;  %v505_v14 = vld [vmem:[%s1259_s1] sm:$0x1] }
  0x73   :  { %v498_v7 = vsel %vm378_vm1, %v451_v13, 0.0  ;;  %v509_v52 = vmul.f32 %v508_v43, %v507_v41 }
  0x74   :  { %v415_v49 = vadd.f32 %v414_v32, %v413_v39  ;;  %v487_v28 = vadd.f32 %v486_v26, %v485_v47  ;;  %v500_v36 = vsel %vm378_vm1, %v452_v18, 0.0 }
  0x76   :  { %v417_v44 = vadd.f32 %v416_v25, %v415_v49  ;;  %v489_v59 = vadd.f32 %v488_v50, %v487_v28 }
  0x78   :  { %v419_v12 = vadd.f32 %v418_v58, %v417_v44  ;;  %v491_v5 = vadd.f32 %v490_v53, %v489_v59  ;;  %v510_v58 = vmul.f32 %v509_v52, %v507_v41 }
  0x7a   :  { %v421_v21 = vadd.f32 %v420_v40, %v419_v12  ;;  %v493_v30 = vadd.f32 %v492_v34, %v491_v5 }
  0x7c   :  { %v423_v63 = vadd.f32 %v422_v55, %v421_v21  ;;  %v495_v0 = vadd.f32 %v494_v11, %v493_v30 }
  0x7e   :  { %v425_v10 = vadd.f32 %v424_v3, %v423_v63  ;;  %v497_v29 = vadd.f32 %v496_v31, %v495_v0 }
  0x80   :  { %v427_v35 = vadd.f32 %v426_v4, %v425_v10  ;;  %v499_v61 = vadd.f32 %v498_v7, %v497_v29 }
  0x82   :  { %642 = vrcp.f32 %v427_v35  ;;  %v501_v8 = vadd.f32 %v500_v36, %v499_v61 }
  0x8f   :  { %v643_v24 = vpop.eup %642 }
  0x90   :  { %v503_v9 = vmul.f32 %v643_v24, %v501_v8 }
  0x92   :  { %v511_v19 = vadd.f32 1e-10, %v503_v9  ;;  %v504_v62 = vmul.f32 3.0, %v503_v9  ;;  %v528_v26 = vmul.f32 -0.5, %v503_v9 }
  0x94   :  { %644 = vrcp.f32 %v511_v19  ;;  %v506_v20 = vmul.f32 %v505_v14, %v504_v62 }
  0x96   :  { %v532_v33 = vmul.f32 -0.45855, %v506_v20 }
  0xa1   :  { %v645_v51 = vpop.eup %644 }
  0xa2   :  { %v513_v42 = vmul.f32 %v645_v51, %v506_v20 }
  0xa4   :  { %v514_v32 = vadd.f32 1e-10, %v513_v42 }
  0xa6   :  { %646 = vrsqrt.f32 %v514_v32  ;;  %vm517_vm2 = vcmp.eq.f32.partialorder %v514_v32, inf  ;;  %v520_v39 = vand.u32 2147483648, %v514_v32  ;;  %vm519_vm3 = vcmp.eq.f32.partialorder %v514_v32, 0.0 }
  0xb3   :  { %v647_v38 = vpop.eup %646 }
  0xb4   :  { %v516_v45 = vmul.f32 %v647_v38, %v514_v32 }
  0xb6   :  { %v518_v46 = vsel %vm517_vm2, %v514_v32, %v516_v45 }
  0xb7   :  { %v521_v25 = vsel %vm519_vm3, %v520_v39, %v518_v46 }
  0xb8   :  { %v522_v48 = vmul.f32 0.3385, %v521_v25 }
  0xba   :  { %v523_v49 = vadd.f32 2.883, %v522_v48 }
  0xbc   :  { %v524_v56 = vmul.f32 %v523_v49, %v523_v49 }
  0xbe   :  { %v525_v57 = vmul.f32 %v524_v56, %v524_v56 }
  0xc0   :  { %v526_v60 = vmul.f32 %v525_v57, %v524_v56 }
  0xc2   :  { %v527_v27 = vmul.f32 %v526_v60, %v524_v56  ;;  %v529_v44 = vadd.f32 %v526_v60, %v509_v52 }
  0xc4   :  { %648 = vrcp.f32 %v529_v44  ;;  %v533_v54 = vadd.f32 %v527_v27, %v510_v58 }
  0xc6   :  { %650 = vrcp.f32 %v533_v54 }
  0xd1   :  { %v649_v40 = vpop.eup %648 }
  0xd2   :  { %v531_v47 = vmul.f32 %v649_v40, %v528_v26 }
  0xd3   :  { %v651_v23 = vpop.eup %650 }
  0xd4   :  { %v535_v12 = vmul.f32 %v651_v23, %v532_v33 }
  0xd6   :  { %v536_v15 = vadd.f32 %v535_v12, %v531_v47 }
  0xd8   :  { %537 = vst [vmem:[%s1261_s5] sm:$0x1] %v536_v15 }

</bundles_post_ra>
